<compile_context>
chip_gen: v7x
topology: tpu7x:2x2x1
jax: 0.10.0
libtpu: 0.0.40
codegen_flags: <defaults>
</compile_context>

<pallas_src>
import jax
import jax.numpy as jnp
from jax.experimental import pallas as pl
from jax.experimental.pallas import tpu as pltpu


# ----------------------------------------------------------------------------
# Weight pre-combination (wrapper-side, tiny tensors).
# Padded-tap view taps[(dr, dc)][i, j] = x[i + dr - 1, j + dc - 1].
# For output parity a:  tap dr=0 carries 3x3 rows {0} (a=0 only),
#                       tap dr=1 carries {1,2} (a=0) or {0,1} (a=1),
#                       tap dr=2 carries {2} (a=1 only).  Same for columns.
# ----------------------------------------------------------------------------

def _combine_weights_2x2(weight_oihw):
    """(Cout, Cin, 3, 3) -> (2, 2, 4*Cin, Cout); taps stacked (r,s)=(0,0),(0,1),(1,0),(1,1)."""
    cout, cin, kh, kw = weight_oihw.shape
    assert (kh, kw) == (3, 3)
    w = jnp.transpose(weight_oihw, (2, 3, 1, 0)).astype(jnp.float32)   # (3,3,Cin,Cout)
    K = (((0,), (1, 2)), ((0, 1), (2,)))     # K[parity][r] -> merged 3x3 indices
    par_rows = []
    for a in range(2):
        par_cols = []
        for v in range(2):
            blocks = []
            for r in range(2):
                for s in range(2):
                    acc = jnp.zeros((cin, cout), jnp.float32)
                    for i in K[a][r]:
                        for j in K[v][s]:
                            acc = acc + w[i, j]
                    blocks.append(acc)
            par_cols.append(jnp.concatenate(blocks, axis=0))            # (4Cin, Cout)
        par_rows.append(jnp.stack(par_cols, axis=0))                    # (2, 4Cin, Cout)
    return jnp.stack(par_rows, axis=0)                                  # (2, 2, 4Cin, Cout)


def _combine_weights_9c(weight_oihw):
    """(Cout, Cin, 3, 3) -> (9*Cin, 4*Cout): all four parities folded into one RHS.

    Row blocks ordered by padded tap k = dr*3 + dc; column blocks ordered by
    parity p = a*2 + v (matching the kernel's lane concat and column split).
    Unused taps for a given parity are exact zeros (they add MACs, not error).
    """
    cout, cin, kh, kw = weight_oihw.shape
    assert (kh, kw) == (3, 3)
    w = jnp.transpose(weight_oihw, (2, 3, 1, 0)).astype(jnp.float32)   # (3,3,Cin,Cout)
    R = (((0,), (1, 2), ()), ((), (0, 1), (2,)))   # R[parity][tap] -> merged indices
    cols = []
    for a in range(2):
        for v in range(2):
            rows = []
            for dr in range(3):
                for dc in range(3):
                    blk = jnp.zeros((cin, cout), jnp.float32)
                    for i3 in R[a][dr]:
                        for j3 in R[v][dc]:
                            blk = blk + w[i3, j3]
                    rows.append(blk)
            cols.append(jnp.concatenate(rows, axis=0))                  # (9Cin, Cout)
    return jnp.concatenate(cols, axis=1)                                # (9Cin, 4Cout)


# ----------------------------------------------------------------------------
# Row-tile selection: largest divisor of H whose per-tile footprint (f32 output
# block double-buffered + bf16 matmul LHS + f32 result) fits an ~8 MiB budget,
# capped so the grid has >= ~4 row steps for pipelining / 2-TC balance.
# Total kernel VMEM (incl. resident bf16 padded input + weights) then stays
# well below v7x's 64 MiB physical VMEM.
# ----------------------------------------------------------------------------

def _pick_row_tile(H, W, C):
    per_row_bytes = 72 * W * C                      # conservative: out(2buf)+lhs+acc
    budget = 8 * 1024 * 1024
    target = max(1, budget // per_row_bytes)
    target = min(target, max(8, -(-H // 4)))        # keep several grid steps
    th = 1
    for d in range(1, H + 1):
        if H % d == 0 and d <= target:
            th = d
    return th


# ----------------------------------------------------------------------------
# Kernels.  x_ref: (1, H+2, W+2, C) bf16 zero-padded NHWC, resident per batch.
#           o_ref: (1, TH, 2, W, 2C) packed output; o[0,i,a,j,v*C+c] = y[2i+a,2j+v,c].
# ----------------------------------------------------------------------------

def _make_kernel(TH, W, C, fold_parities):
    HW = TH * W

    if fold_parities:
        # Small C: one im2col matmul (TH*W, 9C) @ (9C, 4C) covering all 4 parities.
        def kernel(x_ref, w_ref, b_ref, o_ref):
            t = pl.program_id(1)
            row0 = pl.multiple_of(t * TH, TH)
            taps = []
            for dr in range(3):                              # static 3x3 tap views
                for dc in range(3):
                    taps.append(x_ref[0, pl.ds(row0 + dr, TH), dc:dc + W, :])
            lhs = jnp.concatenate(taps, axis=-1).reshape(HW, 9 * C)     # bf16
            res = jnp.dot(lhs, w_ref[...],
                          preferred_element_type=jnp.float32)           # (HW, 4C) f32
            res = res + b_ref[...]                                       # bias once
            for a in range(2):                                           # row parity
                half = res[:, a * 2 * C:(a + 1) * 2 * C]                  # (HW, 2C)
                o_ref[0, :, a, :, :] = half.reshape(TH, W, 2 * C).astype(o_ref.dtype)
        return kernel

    # Large C: K=C already fills the MXU -> four accumulating dots per parity,
    # no lane concat, only one (HW, C) f32 accumulator live at a time.
    def kernel(x_ref, w_ref, b_ref, o_ref):
        t = pl.program_id(1)
        row0 = pl.multiple_of(t * TH, TH)
        bias = jnp.broadcast_to(b_ref[...], (HW, C))          # hoisted, broadcast once
        for a in range(2):                                    # output row parity
            halves = []
            for v in range(2):                                # output col parity
                acc = bias
                for r in range(2):
                    for s in range(2):
                        tap = x_ref[0, pl.ds(row0 + a + r, TH), v + s:v + s + W, :]
                        wblk = w_ref[a, v, (r * 2 + s) * C:(r * 2 + s + 1) * C, :]
                        acc = acc + jnp.dot(tap.reshape(HW, C), wblk,
                                            preferred_element_type=jnp.float32)
                halves.append(acc)
            out_a = jnp.concatenate(halves, axis=-1)                     # (HW, 2C)
            o_ref[0, :, a, :, :] = out_a.reshape(TH, W, 2 * C).astype(o_ref.dtype)
    return kernel


# ----------------------------------------------------------------------------
# Wrapper: conv3x3(pad=1)(nearest_upsample_2x(x)), NCHW in / NCHW out.
# ----------------------------------------------------------------------------

def upsample_forward(x_nchw, weight_oihw, bias):
    B, C, H, W = x_nchw.shape
    assert weight_oihw.shape == (C, C, 3, 3)
    assert bias.shape == (C,)

    # Layout pre-pass (fused by XLA into one copy): NCHW->NHWC, bf16 cast, zero-pad.
    x_nhwc = jnp.transpose(x_nchw, (0, 2, 3, 1)).astype(jnp.bfloat16)
    x_pad = jnp.pad(x_nhwc, ((0, 0), (1, 1), (1, 1), (0, 0)))

    TH = _pick_row_tile(H, W, C)
    fold_parities = C < 128

    if fold_parities:
        w_arg = _combine_weights_9c(weight_oihw).astype(jnp.bfloat16)    # (9C, 4C)
        b_arg = jnp.tile(bias.astype(jnp.float32), 4).reshape(1, 4 * C)  # per column group
        w_spec = pl.BlockSpec((9 * C, 4 * C), lambda b, t: (0, 0))       # resident
        b_spec = pl.BlockSpec((1, 4 * C), lambda b, t: (0, 0))           # resident
    else:
        w_arg = _combine_weights_2x2(weight_oihw).astype(jnp.bfloat16)   # (2,2,4C,C)
        b_arg = bias.astype(jnp.float32).reshape(1, C)
        w_spec = pl.BlockSpec((2, 2, 4 * C, C), lambda b, t: (0, 0, 0, 0))
        b_spec = pl.BlockSpec((1, C), lambda b, t: (0, 0))

    kernel = _make_kernel(TH, W, C, fold_parities)

    out_packed = pl.pallas_call(
        kernel,
        out_shape=jax.ShapeDtypeStruct((B, H, 2, W, 2 * C), x_nchw.dtype),
        grid_spec=pltpu.PrefetchScalarGridSpec(
            num_scalar_prefetch=0,
            grid=(B, H // TH),
            in_specs=[
                # Full padded image, resident across the row-tile axis (index map
                # is constant in t -> one HBM->VMEM DMA per batch element).
                pl.BlockSpec((1, H + 2, W + 2, C), lambda b, t: (b, 0, 0, 0)),
                w_spec,
                b_spec,
            ],
            out_specs=pl.BlockSpec((1, TH, 2, W, 2 * C),
                                   lambda b, t: (b, t, 0, 0, 0)),
        ),
        compiler_params=pltpu.CompilerParams(
            dimension_semantics=("parallel", "arbitrary"),
            vmem_limit_bytes=48 * 1024 * 1024,
        ),
    )(x_pad, w_arg, b_arg)

    # (B, H, 2, W, 2C) row-major IS (B, 2H, 2W, C) row-major: free reshape.
    out_nhwc = out_packed.reshape(B, 2 * H, 2 * W, C)
    # TODO(synk): keep NHWC end-to-end in the UNet; this transpose is an extra
    # HBM round trip of the 4x-sized output, needed only for the NCHW contract.
    return jnp.transpose(out_nhwc, (0, 3, 1, 2))


# ----------------------------------------------------------------------------
# Self-test
# ----------------------------------------------------------------------------

def _reference(x, weight, bias):
    C = x.shape[1]
    up = jnp.repeat(jnp.repeat(x, 2, axis=2), 2, axis=3)
    y = jax.lax.conv_general_dilated(
        up, weight, window_strides=(1, 1), padding=((1, 1), (1, 1)),
        dimension_numbers=("NCHW", "OIHW", "NCHW"),
        precision=jax.lax.Precision.HIGHEST)
    return y + bias.reshape(1, C, 1, 1)


def _check(out, ref, name):
    err = float(jnp.max(jnp.abs(out - ref)))
    scale = float(jnp.max(jnp.abs(ref))) + 1e-6
    assert err <= 2e-2 * scale + 1e-3, (name, err, scale)


if __name__ == "__main__":
    key = jax.random.PRNGKey(0)
    k1, k2, k3, k4, k5, k6 = jax.random.split(key, 6)
    fwd = jax.jit(upsample_forward)

    # Case 1: small C -> folded-parity (9C) im2col path, multi-row-tile grid (2, 2).
    B, C, H, W = 2, 32, 16, 16
    x = jax.random.normal(k1, (B, C, H, W), dtype=jnp.float32)
    w = 0.05 * jax.random.normal(k2, (C, C, 3, 3), dtype=jnp.float32)
    b = 0.1 * jax.random.normal(k3, (C,), dtype=jnp.float32)
    out = jax.block_until_ready(fwd(x, w, b))
    assert out.shape == (B, C, 2 * H, 2 * W), out.shape
    _check(out, _reference(x, w, b), "small-C path")

    # Case 2: C >= 128 -> accumulating K=C dots path (no lane concat).
    B, C, H, W = 1, 128, 8, 8
    x = jax.random.normal(k4, (B, C, H, W), dtype=jnp.float32)
    w = 0.05 * jax.random.normal(k5, (C, C, 3, 3), dtype=jnp.float32)
    b = 0.1 * jax.random.normal(k6, (C,), dtype=jnp.float32)
    out = jax.block_until_ready(fwd(x, w, b))
    assert out.shape == (B, C, 2 * H, 2 * W), out.shape
    _check(out, _reference(x, w, b), "large-C path")

    print("KERNEL_OK")
</pallas_src>

<mosaic_0001>
module attributes {stable_mosaic.version = 11 : i64} {
  func.func @kernel(%arg0: i32, %arg1: i32, %arg2: memref<1x18x18x32xbf16, #tpu.memory_space<vmem>>, %arg3: memref<288x128xbf16, #tpu.memory_space<vmem>>, %arg4: memref<1x128xf32, #tpu.memory_space<vmem>>, %arg5: memref<1x8x2x16x64xf32, #tpu.memory_space<vmem>>) attributes {dimension_semantics = [#tpu.dimension_semantics<parallel>, #tpu.dimension_semantics<arbitrary>], iteration_bounds = array<i64: 2, 2>, scalar_prefetch = 0 : i64, scratch_operands = 0 : i64, tpu.core_type = #tpu.core_type<tc>, window_params = [{transform_indices = @transform_0, window_bounds = array<i64: 1, 18, 18, 32>}, {pipeline_mode = #tpu.pipeline_mode<synchronous>, transform_indices = @transform_1, window_bounds = array<i64: 288, 128>}, {pipeline_mode = #tpu.pipeline_mode<synchronous>, transform_indices = @transform_2, window_bounds = array<i64: 1, 128>}, {transform_indices = @transform_3, window_bounds = array<i64: 1, 8, 2, 16, 64>}]} {
    %c8_i32 = arith.constant 8 : i32
    %0 = arith.muli %arg1, %c8_i32 : i32
    %1 = tpu.assume_multiple %0, 8 : i32
    %c0_i32 = arith.constant 0 : i32
    %2 = arith.addi %1, %c0_i32 : i32
    %c0 = arith.constant 0 : index
    %3 = arith.index_cast %2 : i32 to index
    %c0_0 = arith.constant 0 : index
    %c0_1 = arith.constant 0 : index
    %4 = vector.load %arg2[%c0, %3, %c0_0, %c0_1] : memref<1x18x18x32xbf16, #tpu.memory_space<vmem>>, vector<1x8x16x32xbf16>
    %5 = vector.shape_cast %4 : vector<1x8x16x32xbf16> to vector<8x16x32xbf16>
    %c0_i32_2 = arith.constant 0 : i32
    %6 = arith.addi %1, %c0_i32_2 : i32
    %c0_3 = arith.constant 0 : index
    %7 = arith.index_cast %6 : i32 to index
    %c1 = arith.constant 1 : index
    %c0_4 = arith.constant 0 : index
    %8 = vector.load %arg2[%c0_3, %7, %c1, %c0_4] : memref<1x18x18x32xbf16, #tpu.memory_space<vmem>>, vector<1x8x16x32xbf16>
    %9 = vector.shape_cast %8 : vector<1x8x16x32xbf16> to vector<8x16x32xbf16>
    %c0_i32_5 = arith.constant 0 : i32
    %10 = arith.addi %1, %c0_i32_5 : i32
    %c0_6 = arith.constant 0 : index
    %11 = arith.index_cast %10 : i32 to index
    %c2 = arith.constant 2 : index
    %c0_7 = arith.constant 0 : index
    %12 = vector.load %arg2[%c0_6, %11, %c2, %c0_7] : memref<1x18x18x32xbf16, #tpu.memory_space<vmem>>, vector<1x8x16x32xbf16>
    %13 = vector.shape_cast %12 : vector<1x8x16x32xbf16> to vector<8x16x32xbf16>
    %c1_i32 = arith.constant 1 : i32
    %14 = arith.addi %1, %c1_i32 : i32
    %c0_8 = arith.constant 0 : index
    %15 = arith.index_cast %14 : i32 to index
    %c0_9 = arith.constant 0 : index
    %c0_10 = arith.constant 0 : index
    %16 = vector.load %arg2[%c0_8, %15, %c0_9, %c0_10] : memref<1x18x18x32xbf16, #tpu.memory_space<vmem>>, vector<1x8x16x32xbf16>
    %17 = vector.shape_cast %16 : vector<1x8x16x32xbf16> to vector<8x16x32xbf16>
    %c1_i32_11 = arith.constant 1 : i32
    %18 = arith.addi %1, %c1_i32_11 : i32
    %c0_12 = arith.constant 0 : index
    %19 = arith.index_cast %18 : i32 to index
    %c1_13 = arith.constant 1 : index
    %c0_14 = arith.constant 0 : index
    %20 = vector.load %arg2[%c0_12, %19, %c1_13, %c0_14] : memref<1x18x18x32xbf16, #tpu.memory_space<vmem>>, vector<1x8x16x32xbf16>
    %21 = vector.shape_cast %20 : vector<1x8x16x32xbf16> to vector<8x16x32xbf16>
    %c1_i32_15 = arith.constant 1 : i32
    %22 = arith.addi %1, %c1_i32_15 : i32
    %c0_16 = arith.constant 0 : index
    %23 = arith.index_cast %22 : i32 to index
    %c2_17 = arith.constant 2 : index
    %c0_18 = arith.constant 0 : index
    %24 = vector.load %arg2[%c0_16, %23, %c2_17, %c0_18] : memref<1x18x18x32xbf16, #tpu.memory_space<vmem>>, vector<1x8x16x32xbf16>
    %25 = vector.shape_cast %24 : vector<1x8x16x32xbf16> to vector<8x16x32xbf16>
    %c2_i32 = arith.constant 2 : i32
    %26 = arith.addi %1, %c2_i32 : i32
    %c0_19 = arith.constant 0 : index
    %27 = arith.index_cast %26 : i32 to index
    %c0_20 = arith.constant 0 : index
    %c0_21 = arith.constant 0 : index
    %28 = vector.load %arg2[%c0_19, %27, %c0_20, %c0_21] : memref<1x18x18x32xbf16, #tpu.memory_space<vmem>>, vector<1x8x16x32xbf16>
    %29 = vector.shape_cast %28 : vector<1x8x16x32xbf16> to vector<8x16x32xbf16>
    %c2_i32_22 = arith.constant 2 : i32
    %30 = arith.addi %1, %c2_i32_22 : i32
    %c0_23 = arith.constant 0 : index
    %31 = arith.index_cast %30 : i32 to index
    %c1_24 = arith.constant 1 : index
    %c0_25 = arith.constant 0 : index
    %32 = vector.load %arg2[%c0_23, %31, %c1_24, %c0_25] : memref<1x18x18x32xbf16, #tpu.memory_space<vmem>>, vector<1x8x16x32xbf16>
    %33 = vector.shape_cast %32 : vector<1x8x16x32xbf16> to vector<8x16x32xbf16>
    %c2_i32_26 = arith.constant 2 : i32
    %34 = arith.addi %1, %c2_i32_26 : i32
    %c0_27 = arith.constant 0 : index
    %35 = arith.index_cast %34 : i32 to index
    %c2_28 = arith.constant 2 : index
    %c0_29 = arith.constant 0 : index
    %36 = vector.load %arg2[%c0_27, %35, %c2_28, %c0_29] : memref<1x18x18x32xbf16, #tpu.memory_space<vmem>>, vector<1x8x16x32xbf16>
    %37 = vector.shape_cast %36 : vector<1x8x16x32xbf16> to vector<8x16x32xbf16>
    %38 = tpu.concatenate %5, %9, %13, %17, %21, %25, %29, %33, %37 in 2 : vector<8x16x32xbf16>, vector<8x16x32xbf16>, vector<8x16x32xbf16>, vector<8x16x32xbf16>, vector<8x16x32xbf16>, vector<8x16x32xbf16>, vector<8x16x32xbf16>, vector<8x16x32xbf16>, vector<8x16x32xbf16> -> vector<8x16x288xbf16>
    %39 = vector.shape_cast %38 : vector<8x16x288xbf16> to vector<128x288xbf16>
    %c0_30 = arith.constant 0 : index
    %c0_31 = arith.constant 0 : index
    %40 = vector.load %arg3[%c0_30, %c0_31] : memref<288x128xbf16, #tpu.memory_space<vmem>>, vector<288x128xbf16>
    %cst = arith.constant dense<0.000000e+00> : vector<128x128xf32>
    %41 = tpu.matmul %39, %40, %cst {dimension_numbers = #tpu.dot_dimension_numbers<[1], [0], [0], [1], [0, 0, 1, 1], [], []>} : vector<128x288xbf16>, vector<288x128xbf16>, vector<128x128xf32> -> vector<128x128xf32>
    %c0_32 = arith.constant 0 : index
    %c0_33 = arith.constant 0 : index
    %42 = vector.load %arg4[%c0_32, %c0_33] : memref<1x128xf32, #tpu.memory_space<vmem>>, vector<1x128xf32>
    %43 = vector.broadcast %42 : vector<1x128xf32> to vector<128x128xf32>
    %44 = arith.addf %41, %43 : vector<128x128xf32>
    %45 = vector.extract_strided_slice %44 {offsets = [0, 0], sizes = [128, 64], strides = [1, 1]} : vector<128x128xf32> to vector<128x64xf32>
    %46 = vector.shape_cast %45 : vector<128x64xf32> to vector<8x16x64xf32>
    %c0_34 = arith.constant 0 : index
    %c0_35 = arith.constant 0 : index
    %c0_36 = arith.constant 0 : index
    %c0_37 = arith.constant 0 : index
    %c0_38 = arith.constant 0 : index
    %47 = vector.load %arg5[%c0_34, %c0_35, %c0_36, %c0_37, %c0_38] : memref<1x8x2x16x64xf32, #tpu.memory_space<vmem>>, vector<1x8x1x16x64xf32>
    %48 = vector.shape_cast %47 : vector<1x8x1x16x64xf32> to vector<8x16x64xf32>
    %49 = vector.shape_cast %46 : vector<8x16x64xf32> to vector<1x8x1x16x64xf32>
    tpu.vector_store %arg5[%c0_34, %c0_35, %c0_36, %c0_37, %c0_38], %49 {strides = array<i32>} : memref<1x8x2x16x64xf32, #tpu.memory_space<vmem>>, vector<1x8x1x16x64xf32>,
    %50 = vector.extract_strided_slice %44 {offsets = [0, 64], sizes = [128, 64], strides = [1, 1]} : vector<128x128xf32> to vector<128x64xf32>
    %51 = vector.shape_cast %50 : vector<128x64xf32> to vector<8x16x64xf32>
    %c0_39 = arith.constant 0 : index
    %c0_40 = arith.constant 0 : index
    %c1_41 = arith.constant 1 : index
    %c0_42 = arith.constant 0 : index
    %c0_43 = arith.constant 0 : index
    %52 = vector.load %arg5[%c0_39, %c0_40, %c1_41, %c0_42, %c0_43] : memref<1x8x2x16x64xf32, #tpu.memory_space<vmem>>, vector<1x8x1x16x64xf32>
    %53 = vector.shape_cast %52 : vector<1x8x1x16x64xf32> to vector<8x16x64xf32>
    %54 = vector.shape_cast %51 : vector<8x16x64xf32> to vector<1x8x1x16x64xf32>
    tpu.vector_store %arg5[%c0_39, %c0_40, %c1_41, %c0_42, %c0_43], %54 {strides = array<i32>} : memref<1x8x2x16x64xf32, #tpu.memory_space<vmem>>, vector<1x8x1x16x64xf32>,
    return
  }
  func.func @transform_0(%arg0: i32, %arg1: i32) -> (i32, i32, i32, i32) {
    %c0_i32 = arith.constant 0 : i32
    %c0_i32_0 = arith.constant 0 : i32
    %c0_i32_1 = arith.constant 0 : i32
    %c0_i32_2 = arith.constant 0 : i32
    return %arg0, %c0_i32, %c0_i32_0, %c0_i32_1 : i32, i32, i32, i32
  }
  func.func @transform_1(%arg0: i32, %arg1: i32) -> (i32, i32) {
    %c0_i32 = arith.constant 0 : i32
    %c0_i32_0 = arith.constant 0 : i32
    %c0_i32_1 = arith.constant 0 : i32
    return %c0_i32, %c0_i32_0 : i32, i32
  }
  func.func @transform_2(%arg0: i32, %arg1: i32) -> (i32, i32) {
    %c0_i32 = arith.constant 0 : i32
    %c0_i32_0 = arith.constant 0 : i32
    %c0_i32_1 = arith.constant 0 : i32
    return %c0_i32, %c0_i32_0 : i32, i32
  }
  func.func @transform_3(%arg0: i32, %arg1: i32) -> (i32, i32, i32, i32, i32) {
    %c0_i32 = arith.constant 0 : i32
    %c0_i32_0 = arith.constant 0 : i32
    %c0_i32_1 = arith.constant 0 : i32
    %c0_i32_2 = arith.constant 0 : i32
    return %arg0, %arg1, %c0_i32, %c0_i32_0, %c0_i32_1 : i32, i32, i32, i32, i32
  }
}

</mosaic_0001>

<bundles_post_ra>
// kernel: tile.8
= control target key start
LH: loop header
LB: loop body
LE: loop exit
PB: predicated region body
PF: predicated region fallthrough
CT: control target
= control target key end

     0   :  { %s22_s0 = inlined_call_operand.vmem [shape: f32[32], index: 0, kind: input, shape index: {}]   ;;  %s23_s1 = inlined_call_operand.vmem [shape: f32[4,32], index: 1, kind: output, shape index: {}]  }
   0x1   :  { %v4_v0 = vld [vmem:[%s22_s0] ss:$0 sm:$0xff] }
   0x2   :  { %5 = vst [vmem:[%s23_s1] sm:$0xf] %v4_v0 }

// kernel: tile.9
= control target key start
LH: loop header
LB: loop body
LE: loop exit
PB: predicated region body
PF: predicated region fallthrough
CT: control target
= control target key end

     0   :  { %vm7_vm0 = vcmask 261120   ;;  %s37_s8 = smov 32   ;;  %s38_s9 = smov 64   ;;  %vm13_vm1 = vcmask 1048320   ;;  %vm19_vm2 = vcmask 785920   ;;  %vm25_vm3 = vcmask 523520   ;;  %s55_s0 = inlined_call_operand.vmem [shape: f32[4,32], index: 0, kind: input, shape index: {}]   ;;  %s56_s1 = inlined_call_operand.vmem [shape: f32[1,128], index: 1, kind: output, shape index: {}]  }
   0x1   :  { %v4_v0 = vld [vmem:[%s55_s0] sm:$0xf]  ;;  %s36_s0 = smov 96  }
   0x2   :  { %5 = vst [vmem:[#allocation1] sm:$0xf] %v4_v0 }
   0x9   :  { %v10_v1 = vld [vmem:[#allocation1 + $0x3] sm:$0x1]   ;;  %v22_v2 = vld [vmem:[#allocation1 + $0x1] sm:$0x1]   ;;  %v6_v3 = vld [vmem:[#allocation1] sm:$0x1]  }
   0xa   :  { %11 = vrot.lane.b32.xlu0 %v10_v1, %s36_s0  ;;  %23 = vrot.lane.b32.xlu1 %v22_v2, %s37_s8  ;;  %v16_v4 = vld [vmem:[#allocation1 + $0x2] sm:$0x1]   ;;  %8 = vst.msk [vmem:[#allocation0] sm:$0x1] %vm7_vm0, %v6_v3  }
   0xe   :  { %17 = vrot.lane.b32.xlu0 %v16_v4, %s38_s9 }
  0x7c   :  { %v12_v5 = vpop.permute.xlu0 %11   ;;  %v24_v6 = vpop.permute.xlu1 %23  }
  0x7d   :  { %14 = vst.msk [vmem:[#allocation0] sm:$0x1] %vm13_vm1, %v12_v5  }
  0x80   :  { %v18_v7 = vpop.permute.xlu0 %17  }
  0x81   :  { %20 = vst.msk [vmem:[#allocation0] sm:$0x1] %vm19_vm2, %v18_v7  }
  0x82   :  { %26 = vst.msk [vmem:[#allocation0] sm:$0x1] %vm25_vm3, %v24_v6  }
  0x89   :  { %v30_v8 = vld [vmem:[#allocation0] sm:$0x1] }
  0x8a   :  { %32 = vst [vmem:[%s56_s1] sm:$0x1] %v30_v8 }

// kernel: upsample_forward.1
= control target key start
LH: loop header
LB: loop body
LE: loop exit
PB: predicated region body
PF: predicated region fallthrough
CT: control target
= control target key end

     0   :  { %s2224_s12 = smov 0   ;;  %s2226_s13 = smov 0   ;;  %s3009_s0 = inlined_call_operand.vmem [shape: bf16[2,18,18,32], index: 0, kind: input, shape index: {}]   ;;  %s3010_s1 = inlined_call_operand.vmem [shape: bf16[288,128], index: 1, kind: input, shape index: {}]   ;;  %s3011_s2 = inlined_call_operand.vmem [shape: f32[1,128], index: 2, kind: input, shape index: {}]   ;;  %s3012_s3 = inlined_call_operand.vmem [shape: f32[2,16,2,16,64], index: 3, kind: output, shape index: {}]  }
   0x1   :  { %s2228_s14 = smov 0   ;;  %s2230_s15 = smov 0  }
   0x2   :  { %s2232_s16 = smov 0  }
   0x3 LB: > { %s22_s17 = sadd.s32 1, %s2191_s14  ;;  %s25_s18 = sadd.s32 1, %s2195_s15  ;;  %s2199_s16 = sphi %s2232_s16, %s13_s16   ;;  %s2195_s15 = sphi %s2230_s15, %s3035_s15   ;;  %s2191_s14 = sphi %s2228_s14, %s3034_s14   ;;  %s2187_s13 = sphi %s2226_s13, %s3033_s13   ;;  %s2183_s12 = sphi %s2224_s12, %s3032_s12  }
   0x4   : > { %p23_p0 = scmp.ge.s32.totalorder %s22_s17, 2  ;;  %p1720_p1 = scmp.ge.s32.totalorder %s2199_s16, 1 }
   0x5   : > { %p151_p2 = scmp.lt.s32.totalorder %s2199_s16, 5 }
   0x6   : > { %s3037_s17 = smov (%p23_p0, %s22_s17), 0  ;;  %s3039_s18 = smov (!%p23_p0, %s25_s18), %s2195_s15 }
   0x7   : > { %p152_p3 = pnand %p1720_p1, %p151_p2  ;;  %p27_p4 = scmp.ge.s32.totalorder %s3039_s18, 2 }
   0x9   : > { %s3041_s18 = smov (%p27_p4, %s3039_s18), 0  ;;  %155 = sbr.rel (%p152_p3) target bundleno = 578 (0x242), region = 32 }
  0x10   : > { %p180_p5 = scmp.lt.s32.totalorder %s2187_s13, 1  ;;  %v2141_v0 = vld [vmem:[%s3010_s1 + $0x40] sm:$0xff]   ;;  %s1914_s23 = smul.u32 96, %s2183_s12  ;;  %v2143_v2 = vld [vmem:[%s3010_s1 + $0x48] sm:$0xff]   ;;  %v2145_v4 = vld [vmem:[%s3010_s1 + $0x50] sm:$0xff]   ;;  %vm506_vm0 = vcmask 1046528  }
  0x11   : > { %1915 = vmatprep.subr.bf16.mxu0 %v2141_v0  ;;  %v2142_v1 = vld [vmem:[%s3010_s1] sm:$0xff]   ;;  %2009 = vmatprep.subr.bf16.mxu1 %v2141_v0  ;;  %v2144_v3 = vld [vmem:[%s3010_s1 + $0x8] sm:$0xff]   ;;  %v2146_v5 = vld [vmem:[%s3010_s1 + $0x10] sm:$0xff]   ;;  %s2201_s19 = smov 64   ;;  %vm369_vm1 = vsmask.f32 7424 }
  0x12   : > { %s3043_s13 = smov (!%p180_p5, %s2187_s13), 1  ;;  %1916 = vmatpush3.bf16.msra.mxu0 %v2142_v1  ;;  %2017 = vmatpush3.bf16.msra.mxu1 %v2142_v1  ;;  %v2147_v8 = vld [vmem:[%s3010_s1 + $0x58] sm:$0xff]   ;;  %s2202_s20 = smov 32   ;;  %vm1027_vm2 = vcmask 261120   ;;  %vm1044_vm3 = vcmask 523264   ;;  %vm1061_vm4 = vcmask 785408  }
  0x13   : > { %s2025_s26 = smul.u32 216, %s3043_s13  ;;  %1917 = vmatprep.subr.bf16.mxu0 %v2143_v2  ;;  %2010 = vmatprep.subr.bf16.mxu1 %v2143_v2  ;;  %s2203_s21 = smov 96  }
  0x14   : > { %s1724_s27 = sshll.u32 %s3043_s13, 6 }
  0x15   : > { %s184_s6 = scalar_lea.vmem %s3009_s0, %s2025_s26 }
  0x16   : > { %s2278_s7 = scalar_lea.vmem %s184_s6, %s1914_s23  ;;  %1918 = vmatpush3.bf16.msra.mxu0 %v2144_v3  ;;  %2018 = vmatpush3.bf16.msra.mxu1 %v2144_v3 }
  0x17   : > { %v1777_v6 = vld [vmem:[%s2278_s7 + $0x60] sm:$0xf]  ;;  %v1778_v7 = vld [vmem:[%s2278_s7 + $0x64] sm:$0xf]  ;;  %v1765_v10 = vld [vmem:[%s2278_s7 + $0x18] sm:$0xf]  ;;  %1919 = vmatprep.subr.bf16.mxu0 %v2145_v4  ;;  %2011 = vmatprep.subr.bf16.mxu1 %v2145_v4 }
  0x18   : > { %v2288_v9 = vcombine.low %v1777_v6, %v1778_v7  ;;  %v1766_v11 = vld [vmem:[%s2278_s7 + $0x1c] sm:$0xf]  ;;  %v1789_v12 = vld [vmem:[%s2278_s7 + $0x18] sm:$0xe]  ;;  %v1732_v14 = vld [vmem:[%s2278_s7 + $0x10] sm:$0xf] }
  0x19   : > { %v2293_v13 = vcombine.low %v1765_v10, %v1766_v11  ;;  %v1755_v15 = vld [vmem:[%s2278_s7 + $0xc] sm:$0xe]  ;;  %v1861_v16 = vcombine.low %v1789_v12, %v1766_v11  ;;  %v2300_v17 = vld [vmem:[%s2278_s7 + $0x14] ss:$0 sps:$4 sm:$0x11]  }
  0x1a   : > { %839 = vrot.lane.b32.xlu0 %v2288_v9, %s2201_s19  ;;  %v1837_v18 = vcombine.low %v1755_v15, %v1732_v14  ;;  %v942_v19 = vshll.u32 %v2288_v9, 16  ;;  %v1731_v21 = vld [vmem:[%s2278_s7 + $0xc] sm:$0xf]  ;;  %v2308_v22 = vld [vmem:[%s2278_s7 + $0x58] sm:$0xf]  ;;  %1920 = vmatpush3.bf16.msra.mxu0 %v2146_v5  ;;  %v748_v24 = vrot.slane %v2300_v17, 1 }
  0x1b   : > { %827 = vrot.lane.b32.xlu1 %v2293_v13, %s2201_s19  ;;  %v870_v20 = vshll.u32 %v2293_v13, 16  ;;  %v2311_v25 = vcombine.low %v1731_v21, %v1732_v14  ;;  %v1761_v26 = vld [vmem:[%s2278_s7 + $0x54] sm:$0xe]  ;;  %1921 = vmatprep.subr.bf16.mxu0 %v2147_v8  ;;  %v2315_v27 = vld [vmem:[%s2278_s7 + $0x5c] ss:$0 sps:$4 sm:$0x11]  }
  0x1c   : > { %v747_v23 = vrot.slane %v1837_v18, 1  ;;  %2019 = vmatpush3.bf16.msra.mxu1 %v2146_v5  ;;  %v1843_v28 = vcombine.low %v1761_v26, %v2308_v22  ;;  %v202_v29 = vld [vmem:[%s2278_s7 + $0x4] sm:$0xf]  ;;  %v940_v30 = vshrl.u32 %v2288_v9, 16  ;;  %v2320_v31 = vrot.slane %v1861_v16, 1 }
  0x1d   : > { %2012 = vmatprep.subr.bf16.mxu1 %v2147_v8  ;;  %v225_v33 = vld [vmem:[%s2278_s7] sm:$0xe]  ;;  %v868_v34 = vshrl.u32 %v2293_v13, 16  ;;  %v628_v35 = vshrl.u32 %v2311_v25, 16  ;;  %v766_v37 = vrot.slane %v2315_v27, 1  ;;  %v872_v42 = vrot.slane %v870_v20, 1 }
  0x1e   : > { %v749_v32 = vsel %vm506_vm0, %v747_v23, %v748_v24  ;;  %v765_v36 = vrot.slane %v1843_v28, 1  ;;  %v2078_v38 = vld [vmem:[%s2278_s7 + $0x8] ss:$0 sps:$4 sm:$0x11]   ;;  %v1813_v39 = vcombine.low %v225_v33, %v202_v29  ;;  %v201_v40 = vld [vmem:[%s2278_s7] sm:$0xf] }
  0x1f   : > { %771 = vrot.lane.b32.xlu0 %v749_v32, %s2202_s20  ;;  %587 = vrot.lane.b32.xlu1 %v2311_v25, %s2203_s21  ;;  %v213_v41 = vld [vmem:[%s2278_s7 + $0x48] sm:$0xf]  ;;  %v944_v43 = vrot.slane %v942_v19, 1  ;;  %v508_v46 = vrot.slane %v2078_v38, 1  ;;  %v2334_v47 = vcombine.low %v201_v40, %v202_v29  ;;  %v214_v48 = vld [vmem:[%s2278_s7 + $0x4c] sm:$0xf]  ;;  %v873_v3 = vor.u32 %v872_v42, %v868_v34 }
  0x20   : > { %v767_v44 = vsel %vm506_vm0, %v765_v36, %v766_v37  ;;  %v507_v45 = vrot.slane %v1813_v39, 1  ;;  %v231_v49 = vld [vmem:[%s2278_s7 + $0x48] sm:$0xe]  ;;  %v2338_v50 = vcombine.low %v213_v41, %v214_v48  ;;  %v2082_v51 = vld [vmem:[%s2278_s7 + $0x50] ss:$0 sps:$4 sm:$0x11]  }
  0x21   : > { %v378_v52 = vshll.u32 %v2078_v38, 16  ;;  %v1819_v54 = vcombine.low %v231_v49, %v214_v48  ;;  %v371_v55 = vshrl.u32 %v2334_v47, 16  ;;  %v373_v56 = vshll.u32 %v2334_v47, 16  ;;  %v1743_v57 = vld [vmem:[%s2278_s7 + $0x54] sm:$0xf]  ;;  %v2148_v23 = vld [vmem:[%s3010_s1 + $0x18] sm:$0xff]  }
  0x22   : > { %v509_v53 = vsel %vm506_vm0, %v507_v45, %v508_v46  ;;  %v526_v58 = vrot.slane %v2082_v51, 1  ;;  %v443_v60 = vshrl.u32 %v2338_v50, 16  ;;  %v445_v61 = vshll.u32 %v2338_v50, 16  ;;  %v2350_v1 = vld [vmem:[%s2278_s7 + $0x20] ss:$0 sps:$4 sm:$0x11]   ;;  %1922 = vmatpush3.bf16.msra.mxu0 %v2148_v23  ;;  %2020 = vmatpush3.bf16.msra.mxu1 %v2148_v23 }
  0x23   : > { %783 = vrot.lane.b32.xlu0 %v767_v44, %s2202_s20  ;;  %531 = vrot.lane.b32.xlu1 %v509_v53, %s2201_s19  ;;  %v380_v59 = vrot.slane %v378_v52, 1  ;;  %v525_v62 = vrot.slane %v1819_v54, 1  ;;  %v375_v63 = vrot.slane %v373_v56, 1  ;;  %v450_v0 = vshll.u32 %v2082_v51, 16  ;;  %v203_v5 = vld [vmem:[%s2278_s7 + $0xc] sm:$0xf] }
  0x24   : > { %v447_v2 = vrot.slane %v445_v61, 1  ;;  %v2086_v4 = vld [vmem:[%s2278_s7 + $0x68] ss:$0 sps:$4 sm:$0x11]   ;;  %v875_v9 = vshll.u32 %v2350_v1, 16  ;;  %v630_v11 = vshll.u32 %v2311_v25, 16  ;;  %v2360_v13 = vcombine.low %v1743_v57, %v2308_v22 }
  0x25   : > { %v527_v6 = vsel %vm506_vm0, %v525_v62, %v526_v58  ;;  %v376_v7 = vor.u32 %v375_v63, %v371_v55  ;;  %v452_v8 = vrot.slane %v450_v0, 1  ;;  %v204_v10 = vld [vmem:[%s2278_s7 + $0x10] sm:$0xf]  ;;  %v947_v14 = vshll.u32 %v2086_v4, 16  ;;  %v1734_v21 = vld [vmem:[%s2278_s7 + $0x1c] sm:$0xf] }
  0x26   : > { %v448_v12 = vor.u32 %v447_v2, %v443_v60  ;;  %v2363_v15 = vld [vmem:[%s2278_s7 + $0x14] ss:$0 sps:$4 sm:$0x11]   ;;  %v877_v18 = vrot.slane %v875_v9, 1  ;;  %v945_v19 = vor.u32 %v944_v43, %v940_v30  ;;  %v2366_v20 = vcombine.low %v203_v5, %v204_v10  ;;  %v1756_v29 = vld [vmem:[%s2278_s7 + $0x18] sm:$0xe] }
  0x27   : > { %543 = vrot.lane.b32.xlu1 %v527_v6, %s2201_s19  ;;  %v381_v16 = vsel %vm369_vm1, %v376_v7, %v380_v59  ;;  %v702_v24 = vshll.u32 %v2360_v13, 16  ;;  %v949_v26 = vrot.slane %v947_v14, 1  ;;  %v390_v28 = vshll.u32 %v2363_v15, 16  ;;  %v2149_v30 = vld [vmem:[%s3010_s1 + $0x60] sm:$0xff]   ;;  %v226_v40 = vld [vmem:[%s2278_s7 + $0xc] sm:$0xe] }
  0x28   : > { %466 = vrot.lane.b32.xlu0 %v381_v16, %s2202_s20  ;;  %v453_v22 = vsel %vm369_vm1, %v448_v12, %v452_v8  ;;  %v878_v32 = vsel %vm369_vm1, %v873_v3, %v877_v18  ;;  %v383_v33 = vshrl.u32 %v2366_v20, 16  ;;  %v385_v34 = vshll.u32 %v2366_v20, 16  ;;  %v2384_v36 = vld [vmem:[%s2278_s7 + $0x20] ss:$0 sps:$4 sm:$0x11]   ;;  %1923 = vmatprep.subr.bf16.mxu0 %v2149_v30  ;;  %v2151_v49 = vld [vmem:[%s3010_s1 + $0x68] sm:$0xff]  }
  0x29   : > { %v1838_v37 = vcombine.low %v1756_v29, %v1734_v21  ;;  %v2150_v38 = vld [vmem:[%s3010_s1 + $0x20] sm:$0xff]   ;;  %v392_v39 = vrot.slane %v390_v28, 1  ;;  %v511_v41 = vrot.slane %v2363_v15, 1  ;;  %v751_v45 = vrot.slane %v2384_v36, 1  ;;  %v1768_v48 = vld [vmem:[%s2278_s7 + $0x28] sm:$0xf]  ;;  %2013 = vmatprep.subr.bf16.mxu1 %v2149_v30 }
  0x2a   : > { %v1767_v42 = vld [vmem:[%s2278_s7 + $0x24] sm:$0xf]  ;;  %v387_v43 = vrot.slane %v385_v34, 1  ;;  %v1814_v46 = vcombine.low %v226_v40, %v204_v10  ;;  %v1733_v53 = vld [vmem:[%s2278_s7 + $0x18] sm:$0xf]  ;;  %v950_v54 = vsel %vm369_vm1, %v945_v19, %v949_v26  ;;  %1924 = vmatpush3.bf16.msra.mxu0 %v2150_v38  ;;  %2021 = vmatpush3.bf16.msra.mxu1 %v2150_v38  ;;  %v632_v59 = vrot.slane %v630_v11, 1 }
  0x2b   : > { %478 = vrot.lane.b32.xlu1 %v453_v22, %s2202_s20  ;;  %v750_v44 = vrot.slane %v1838_v37, 1  ;;  %v1790_v51 = vld [vmem:[%s2278_s7 + $0x24] sm:$0xe]  ;;  %v2400_v52 = vcombine.low %v1767_v42, %v1768_v48  ;;  %v2405_v57 = vld [vmem:[%s2278_s7 + $0x2c] ss:$0 sps:$4 sm:$0x11]   ;;  %1925 = vmatprep.subr.bf16.mxu0 %v2151_v49  ;;  %v2427_v7 = vcombine.low %v1733_v53, %v1734_v21 }
  0x2c   : > { %963 = vrot.lane.b32.xlu0 %v878_v32, %s2203_s21  ;;  %v388_v55 = vor.u32 %v387_v43, %v383_v33  ;;  %v510_v56 = vrot.slane %v1814_v46, 1  ;;  %v215_v58 = vld [vmem:[%s2278_s7 + $0x54] sm:$0xf]  ;;  %v1862_v61 = vcombine.low %v1790_v51, %v1768_v48  ;;  %v2412_v62 = vld [vmem:[%s2278_s7 + $0x58] sm:$0xf]  ;;  %v887_v2 = vshll.u32 %v2405_v57, 16  ;;  %2014 = vmatprep.subr.bf16.mxu1 %v2151_v49 }
  0x2d   : > { %v882_v60 = vshll.u32 %v2400_v52, 16  ;;  %v880_v0 = vshrl.u32 %v2400_v52, 16  ;;  %v2418_v3 = vld [vmem:[%s2278_s7 + $0x5c] ss:$0 sps:$4 sm:$0x11]   ;;  %v2152_v4 = vld [vmem:[%s3010_s1 + $0x28] sm:$0xff]   ;;  %v752_v9 = vsel %vm506_vm0, %v750_v44, %v751_v45  ;;  %v2432_v11 = vcombine.low %v215_v58, %v2412_v62 }
  0x2e   : > { %v393_v63 = vsel %vm369_vm1, %v388_v55, %v392_v39  ;;  %v700_v5 = vshrl.u32 %v2360_v13, 16  ;;  %v2424_v6 = vrot.slane %v702_v24, 1  ;;  %v512_v10 = vsel %vm506_vm0, %v510_v56, %v511_v41  ;;  %v1746_v12 = vld [vmem:[%s2278_s7 + $0x64] sm:$0xf]  ;;  %v1762_v14 = vld [vmem:[%s2278_s7 + $0x60] sm:$0xe]  ;;  %1926 = vmatpush3.bf16.msra.mxu0 %v2152_v4  ;;  %2022 = vmatpush3.bf16.msra.mxu1 %v2152_v4 }
  0x2f   : > { %599 = vrot.lane.b32.xlu1 %v2360_v13, %s2203_s21  ;;  %v884_v8 = vrot.slane %v882_v60, 1  ;;  %3017 = vst [vmem:[#allocation2_spill] sm:$0xff] %v2432_v11  ;;  %v2437_v15 = vrot.slane %v1862_v61, 1  ;;  %v640_v16 = vshrl.u32 %v2427_v7, 16  ;;  %v642_v18 = vshll.u32 %v2427_v7, 16  ;;  %v2153_v29 = vld [vmem:[%s3010_s1 + $0x70] sm:$0xff]  }
  0x30   : > { %975 = vrot.lane.b32.xlu0 %v950_v54, %s2203_s21  ;;  %v889_v19 = vrot.slane %v887_v2, 1  ;;  %v232_v21 = vld [vmem:[%s2278_s7 + $0x54] sm:$0xe]  ;;  %v455_v22 = vshrl.u32 %v2432_v11, 16  ;;  %v457_v24 = vshll.u32 %v2432_v11, 16  ;;  %v462_v26 = vshll.u32 %v2418_v3, 16  ;;  %1927 = vmatprep.subr.bf16.mxu0 %v2153_v29 }
  0x31   : > { %v885_v23 = vor.u32 %v884_v8, %v880_v0  ;;  %v1779_v28 = vld [vmem:[%s2278_s7 + $0x6c] sm:$0xf]  ;;  %v2451_v30 = vld [vmem:[%s2278_s7 + $0x68] ss:$0 sps:$4 sm:$0x11]   ;;  %v1844_v32 = vcombine.low %v1762_v14, %v1746_v12  ;;  %v2154_v34 = vld [vmem:[%s3010_s1 + $0x30] sm:$0xff]   ;;  %v1820_v39 = vcombine.low %v232_v21, %v2412_v62  ;;  %2015 = vmatprep.subr.bf16.mxu1 %v2153_v29  ;;  %v633_v46 = vor.u32 %v632_v59, %v628_v35 }
  0x32   : > { %v1780_v33 = vld [vmem:[%s2278_s7 + $0x70] sm:$0xf]  ;;  %v1007_v37 = vrot.slane %v2405_v57, 1  ;;  %v459_v38 = vrot.slane %v457_v24, 1  ;;  %v1796_v40 = vld [vmem:[%s2278_s7 + $0x6c] sm:$0xe]  ;;  %1928 = vmatpush3.bf16.msra.mxu0 %v2154_v34  ;;  %2023 = vmatpush3.bf16.msra.mxu1 %v2154_v34 }
  0x33   : > { %468 = vrot.lane.b32.xlu1 %v393_v63, %s2202_s20  ;;  %v2460_v41 = vcombine.low %v1779_v28, %v1780_v33  ;;  %v1745_v42 = vld [vmem:[%s2278_s7 + $0x60] sm:$0xf]  ;;  %v2464_v43 = vrot.slane %v642_v18, 1  ;;  %v1868_v44 = vcombine.low %v1796_v40, %v1780_v33  ;;  %v2467_v45 = vld [vmem:[%s2278_s7 + $0x74] ss:$0 sps:$4 sm:$0x11]   ;;  %v890_v48 = vsel %vm369_vm1, %v885_v23, %v889_v19 }
  0x34   : > { %773 = vrot.lane.b32.xlu0 %v752_v9, %s2202_s20  ;;  %v460_v49 = vor.u32 %v459_v38, %v455_v22  ;;  %v464_v51 = vrot.slane %v462_v26, 1  ;;  %v205_v54 = vld [vmem:[%s2278_s7 + $0x18] sm:$0xf]  ;;  %v2475_v55 = vld [vmem:[%s2278_s7 + $0x1c] sm:$0xf]  ;;  %v768_v56 = vrot.slane %v1844_v32, 1  ;;  %v2480_v25 = vcombine.low %v1745_v42, %v1746_v12 }
  0x35   : > { %v954_v53 = vshll.u32 %v2460_v41, 16  ;;  %v769_v58 = vrot.slane %v2451_v30, 1  ;;  %v635_v35 = vshll.u32 %v2300_v17, 16  ;;  %v528_v59 = vrot.slane %v1820_v39, 1  ;;  %v1736_v9 = vld [vmem:[%s2278_s7 + $0x28] sm:$0xf] }
  0x36   : > { %v529_v60 = vrot.slane %v2418_v3, 1  ;;  %v952_v61 = vshrl.u32 %v2460_v41, 16  ;;  %v2486_v62 = vcombine.low %v205_v54, %v2475_v55  ;;  %v2493_v63 = vrot.slane %v1868_v44, 1  ;;  %v2504_v12 = vld [vmem:[%s2278_s7 + $0x2c] ss:$0 sps:$4 sm:$0x11]  }
  0x37   : > { %533 = vrot.lane.b32.xlu1 %v512_v10, %s2201_s19  ;;  %v714_v0 = vshll.u32 %v2480_v25, 16  ;;  %v959_v2 = vshll.u32 %v2467_v45, 16  ;;  %v465_v3 = vsel %vm369_vm1, %v460_v49, %v464_v51  ;;  %v956_v4 = vrot.slane %v954_v53, 1  ;;  %v1757_v10 = vld [vmem:[%s2278_s7 + $0x24] sm:$0xe]  ;;  %v2155_v24 = vld [vmem:[%s3010_s1 + $0x78] sm:$0xff]  }
  0x38   : > { %829 = vrot.lane.b32.xlu0 %v2400_v52, %s2201_s19  ;;  %3018 = vst [vmem:[#allocation3_spill] sm:$0xff] %v2486_v62  ;;  %v2489_v52 = vld [vmem:[%s2278_s7 + $0x20] ss:$0 sps:$4 sm:$0x11]   ;;  %v397_v8 = vshll.u32 %v2486_v62, 16  ;;  %v637_v18 = vrot.slane %v635_v35, 1  ;;  %v770_v19 = vsel %vm506_vm0, %v768_v56, %v769_v58  ;;  %v530_v26 = vsel %vm506_vm0, %v528_v59, %v529_v60  ;;  %1929 = vmatprep.subr.bf16.mxu0 %v2155_v24 }
  0x39   : > { %v1769_v14 = vld [vmem:[%s2278_s7 + $0x30] sm:$0xf]  ;;  %v402_v21 = vshll.u32 %v2489_v52, 16  ;;  %v227_v23 = vld [vmem:[%s2278_s7 + $0x18] sm:$0xe]  ;;  %v2516_v28 = vrot.slane %v714_v0, 1  ;;  %v1839_v44 = vcombine.low %v1757_v10, %v1736_v9  ;;  %2016 = vmatprep.subr.bf16.mxu1 %v2155_v24  ;;  %v957_v56 = vor.u32 %v956_v4, %v952_v61 }
  0x3a   : > { %v1770_v22 = vld [vmem:[%s2278_s7 + $0x34] sm:$0xf]  ;;  %v1791_v29 = vld [vmem:[%s2278_s7 + $0x30] sm:$0xe]  ;;  %v1735_v33 = vld [vmem:[%s2278_s7 + $0x24] sm:$0xf]  ;;  %v2523_v34 = vsel %vm369_vm1, %v633_v46, %v637_v18  ;;  %v2558_v4 = vsel %vm506_vm0, %v2437_v15, %v1007_v37 }
  0x3b   : > { %589 = vrot.lane.b32.xlu1 %v2427_v7, %s2203_s21  ;;  %v2519_v32 = vcombine.low %v1769_v14, %v1770_v22  ;;  %v2156_v38 = vld [vmem:[%s3010_s1 + $0x38] sm:$0xff]   ;;  %v961_v39 = vrot.slane %v959_v2, 1  ;;  %v395_v40 = vshrl.u32 %v2486_v62, 16  ;;  %v399_v42 = vrot.slane %v397_v8, 1  ;;  %v207_v53 = vld [vmem:[%s2278_s7 + $0x24] sm:$0xf] }
  0x3c   : > { %965 = vrot.lane.b32.xlu0 %v890_v48, %s2203_s21  ;;  %v1815_v48 = vcombine.low %v227_v23, %v2475_v55  ;;  %v514_v46 = vrot.slane %v2489_v52, 1  ;;  %v1863_v49 = vcombine.low %v1791_v29, %v1770_v22  ;;  %v2532_v51 = vcombine.low %v1735_v33, %v1736_v9  ;;  %1930 = vmatpush3.bf16.msra.mxu0 %v2156_v38  ;;  %v2538_v54 = vld [vmem:[%s3010_s1 + $0x80] sm:$0xff]   ;;  %v2541_v35 = vld [vmem:[%s2278_s7 + $0x38] ss:$0 sps:$4 sm:$0x11]  }
  0x3d   : > { %v404_v58 = vrot.slane %v402_v21, 1  ;;  %v208_v59 = vld [vmem:[%s2278_s7 + $0x28] sm:$0xf]  ;;  %2024 = vmatpush3.bf16.msra.mxu1 %v2156_v38  ;;  %v754_v55 = vrot.slane %v2504_v12, 1  ;;  %v894_v60 = vshll.u32 %v2519_v32, 16  ;;  %v400_v61 = vor.u32 %v399_v42, %v395_v40  ;;  %3020 = vst [vmem:[#allocation5_spill] sm:$0xff] %v2558_v4 }
  0x3e   : > { %v654_v52 = vshll.u32 %v2532_v51, 16  ;;  %v2548_v0 = vcombine.low %v207_v53, %v208_v59  ;;  %1989 = vmatprep.subr.bf16.mxu1 %v2538_v54  ;;  %v753_v2 = vrot.slane %v1839_v44, 1  ;;  %v513_v8 = vrot.slane %v1815_v48, 1  ;;  %v1738_v37 = vld [vmem:[%s2278_s7 + $0x34] sm:$0xf] }
  0x3f   : > { %480 = vrot.lane.b32.xlu1 %v465_v3, %s2202_s20  ;;  %v2552_v3 = vld [vmem:[%s2278_s7 + $0x2c] ss:$0 sps:$4 sm:$0x11]   ;;  %v2562_v9 = vrot.slane %v1863_v49, 1  ;;  %v892_v10 = vshrl.u32 %v2519_v32, 16  ;;  %v707_v14 = vshll.u32 %v2315_v27, 16  ;;  %v962_v18 = vsel %vm369_vm1, %v957_v56, %v961_v39 }
  0x40   : > { %785 = vrot.lane.b32.xlu0 %v770_v19, %s2202_s20  ;;  %3019 = vst [vmem:[#allocation4_spill] sm:$0xff] %v2548_v0  ;;  %v899_v15 = vshll.u32 %v2541_v35, 16  ;;  %v1758_v19 = vld [vmem:[%s2278_s7 + $0x30] sm:$0xe]  ;;  %v2576_v21 = vrot.slane %v654_v52, 1  ;;  %v896_v27 = vrot.slane %v894_v60, 1  ;;  %v405_v24 = vsel %vm369_vm1, %v400_v61, %v404_v58 }
  0x41   : > { %v409_v23 = vshll.u32 %v2548_v0, 16  ;;  %v414_v22 = vshll.u32 %v2552_v3, 16  ;;  %v1771_v29 = vld [vmem:[%s2278_s7 + $0x3c] sm:$0xf]  ;;  %v1772_v13 = vld [vmem:[%s2278_s7 + $0x40] sm:$0xf]  ;;  %v755_v38 = vsel %vm506_vm0, %v753_v2, %v754_v55  ;;  %v515_v55 = vsel %vm506_vm0, %v513_v8, %v514_v46 }
  0x42   : > { %v709_v33 = vrot.slane %v707_v14, 1  ;;  %v901_v39 = vrot.slane %v899_v15, 1  ;;  %v407_v40 = vshrl.u32 %v2548_v0, 16  ;;  %v1792_v42 = vld [vmem:[%s2278_s7 + $0x3c] sm:$0xe]  ;;  %v2593_v53 = vcombine.low %v1771_v29, %v1772_v13 }
  0x43   : > { %545 = vrot.lane.b32.xlu1 %v530_v26, %s2201_s19  ;;  %v228_v26 = vld [vmem:[%s2278_s7 + $0x24] sm:$0xe]  ;;  %v1737_v44 = vld [vmem:[%s2278_s7 + $0x30] sm:$0xf]  ;;  %v411_v48 = vrot.slane %v409_v23, 1  ;;  %v517_v52 = vrot.slane %v2552_v3, 1  ;;  %v1864_v14 = vcombine.low %v1792_v42, %v1772_v13  ;;  %v897_v15 = vor.u32 %v896_v27, %v892_v10 }
  0x44   : > { %841 = vrot.lane.b32.xlu0 %v2460_v41, %s2201_s19  ;;  %v705_v41 = vor.u32 %v2424_v6, %v700_v5  ;;  %v2586_v5 = vld [vmem:[%s2278_s7 + $0x38] ss:$0 sps:$4 sm:$0x11]   ;;  %v1840_v6 = vcombine.low %v1758_v19, %v1738_v37  ;;  %v1816_v49 = vcombine.low %v228_v26, %v208_v59  ;;  %v209_v56 = vld [vmem:[%s2278_s7 + $0x30] sm:$0xf]  ;;  %v416_v2 = vrot.slane %v414_v22, 1 }
  0x45   : > { %v2597_v58 = vld [vmem:[%s2278_s7 + $0x34] sm:$0xf]  ;;  %v2605_v61 = vld [vmem:[%s2278_s7 + $0x44] ss:$0 sps:$4 sm:$0x11]   ;;  %v757_v19 = vrot.slane %v2586_v5, 1  ;;  %v412_v10 = vor.u32 %v411_v48, %v407_v40 }
  0x46   : > { %v2600_v60 = vsel %vm369_vm1, %v705_v41, %v709_v33  ;;  %v756_v59 = vrot.slane %v1840_v6, 1  ;;  %v2612_v41 = vcombine.low %v209_v56, %v2597_v58  ;;  %v2615_v46 = vld [vmem:[%s2278_s7 + $0x38] ss:$0 sps:$4 sm:$0x11]   ;;  %v516_v3 = vrot.slane %v1816_v49, 1 }
  0x47   : > { %601 = vrot.lane.b32.xlu1 %v2480_v25, %s2203_s21  ;;  %v906_v8 = vshll.u32 %v2593_v53, 16  ;;  %v911_v27 = vshll.u32 %v2605_v61, 16  ;;  %v1740_v22 = vld [vmem:[%s2278_s7 + $0x40] sm:$0xf]  ;;  %v647_v26 = vshll.u32 %v2384_v36, 16  ;;  %v2627_v29 = vrot.slane %v1864_v14, 1 }
  0x48   : > { %977 = vrot.lane.b32.xlu0 %v962_v18, %s2203_s21  ;;  %v2608_v18 = vcombine.low %v1737_v44, %v1738_v37  ;;  %3021 = vst [vmem:[#allocation6_spill] sm:$0xff] %v2612_v41  ;;  %v904_v37 = vshrl.u32 %v2593_v53, 16  ;;  %v1773_v6 = vld [vmem:[%s2278_s7 + $0x48] sm:$0xf]  ;;  %v1774_v33 = vld [vmem:[%s2278_s7 + $0x4c] sm:$0xf]  ;;  %v417_v14 = vsel %vm369_vm1, %v412_v10, %v416_v2 }
  0x49   : > { %v421_v40 = vshll.u32 %v2612_v41, 16  ;;  %v426_v42 = vshll.u32 %v2615_v46, 16  ;;  %v229_v44 = vld [vmem:[%s2278_s7 + $0x30] sm:$0xe]  ;;  %v1793_v56 = vld [vmem:[%s2278_s7 + $0x48] sm:$0xe]  ;;  %v2649_v13 = vcombine.low %v1773_v6, %v1774_v33 }
  0x4a   : > { %v666_v23 = vshll.u32 %v2608_v18, 16  ;;  %v2641_v48 = vld [vmem:[%s2278_s7 + $0x44] ss:$0 sps:$4 sm:$0x11]   ;;  %v1739_v57 = vld [vmem:[%s2278_s7 + $0x3c] sm:$0xf]  ;;  %v1817_v7 = vcombine.low %v229_v44, %v2597_v58  ;;  %v518_v58 = vsel %vm506_vm0, %v516_v3, %v517_v52 }
  0x4b   : > { %470 = vrot.lane.b32.xlu1 %v405_v24, %s2202_s20  ;;  %v1759_v24 = vld [vmem:[%s2278_s7 + $0x3c] sm:$0xe]  ;;  %v419_v17 = vshrl.u32 %v2612_v41, 16  ;;  %v428_v2 = vrot.slane %v426_v42, 1  ;;  %v520_v10 = vrot.slane %v2615_v46, 1  ;;  %v2670_v6 = vcombine.low %v1739_v57, %v1740_v22 }
  0x4c   : > { %775 = vrot.lane.b32.xlu0 %v755_v38, %s2202_s20  ;;  %v902_v38 = vsel %vm369_vm1, %v897_v15, %v901_v39  ;;  %v2638_v36 = vrot.slane %v666_v23, 1  ;;  %v1841_v49 = vcombine.low %v1759_v24, %v1740_v22  ;;  %v645_v39 = vor.u32 %v2464_v43, %v640_v16  ;;  %v2653_v23 = vld [vmem:[%s2278_s7 + $0x40] sm:$0xf]  ;;  %v2660_v16 = vld [vmem:[%s2278_s7 + $0x50] ss:$0 sps:$4 sm:$0x11]  }
  0x4d   : > { %v913_v15 = vrot.slane %v911_v27, 1  ;;  %v758_v24 = vsel %vm506_vm0, %v756_v59, %v757_v19  ;;  %v423_v43 = vrot.slane %v421_v40, 1  ;;  %v1865_v19 = vcombine.low %v1793_v56, %v1774_v33  ;;  %v1742_v46 = vld [vmem:[%s2278_s7 + $0x4c] sm:$0xf]  ;;  %v1760_v42 = vld [vmem:[%s2278_s7 + $0x48] sm:$0xe] }
  0x4e   : > { %v759_v59 = vrot.slane %v1841_v49, 1  ;;  %v918_v40 = vshll.u32 %v2649_v13, 16  ;;  %v3023_v44 = vshrl.u32 %v2480_v25, 16  ;;  %v719_v49 = vshll.u32 %v2451_v30, 16 }
  0x4f   : > { %535 = vrot.lane.b32.xlu1 %v515_v55, %s2201_s19  ;;  %v211_v55 = vld [vmem:[%s2278_s7 + $0x3c] sm:$0xf]  ;;  %v760_v57 = vrot.slane %v2641_v48, 1  ;;  %v519_v22 = vrot.slane %v1817_v7, 1  ;;  %v678_v33 = vshll.u32 %v2670_v6, 16  ;;  %v923_v52 = vshll.u32 %v2660_v16, 16 }
  0x50   : > { %831 = vrot.lane.b32.xlu0 %v2519_v32, %s2201_s19  ;;  %v908_v32 = vrot.slane %v906_v8, 1  ;;  %v649_v8 = vrot.slane %v647_v26, 1  ;;  %v2664_v27 = vcombine.low %v211_v55, %v2653_v23  ;;  %v2667_v26 = vld [vmem:[%s2278_s7 + $0x44] ss:$0 sps:$4 sm:$0x11]   ;;  %v717_v55 = vor.u32 %v2516_v28, %v3023_v44 }
  0x51   : > { %v916_v56 = vshrl.u32 %v2649_v13, 16  ;;  %v438_v28 = vshll.u32 %v2667_v26, 16  ;;  %v1015_v30 = vrot.slane %v1865_v19, 1  ;;  %v1794_v7 = vld [vmem:[%s2278_s7 + $0x54] sm:$0xe]  ;;  %v424_v44 = vor.u32 %v423_v43, %v419_v17 }
  0x52   : > { %v909_v3 = vor.u32 %v908_v32, %v904_v37  ;;  %v433_v25 = vshll.u32 %v2664_v27, 16  ;;  %v920_v41 = vrot.slane %v918_v40, 1  ;;  %v1741_v37 = vld [vmem:[%s2278_s7 + $0x48] sm:$0xf]  ;;  %v721_v32 = vrot.slane %v719_v49, 1 }
  0x53   : > { %591 = vrot.lane.b32.xlu1 %v2532_v51, %s2203_s21  ;;  %v680_v4 = vrot.slane %v678_v33, 1  ;;  %v925_v62 = vrot.slane %v923_v52, 1  ;;  %v2701_v19 = vcombine.low %v1741_v37, %v1742_v46  ;;  %v230_v33 = vld [vmem:[%s2278_s7 + $0x3c] sm:$0xe]  ;;  %v1775_v52 = vld [vmem:[%s2278_s7 + $0x54] sm:$0xf] }
  0x54   : > { %967 = vrot.lane.b32.xlu0 %v902_v38, %s2203_s21  ;;  %v2673_v38 = vsel %vm369_vm1, %v645_v39, %v649_v8  ;;  %v2691_v39 = vld [vmem:[%s2278_s7 + $0x50] ss:$0 sps:$4 sm:$0x11]   ;;  %v1842_v8 = vcombine.low %v1760_v42, %v1742_v46  ;;  %v914_v42 = vsel %vm369_vm1, %v909_v3, %v913_v15  ;;  %v435_v11 = vrot.slane %v433_v25, 1 }
  0x55   : > { %3022 = vst [vmem:[#allocation7_spill] sm:$0xff] %v2673_v38  ;;  %v440_v38 = vrot.slane %v438_v28, 1  ;;  %v2705_v17 = vsel %vm369_vm1, %v717_v55, %v721_v32  ;;  %v690_v49 = vshll.u32 %v2701_v19, 16  ;;  %v429_v46 = vsel %vm369_vm1, %v424_v44, %v428_v2 }
  0x56   : > { %v762_v43 = vrot.slane %v1842_v8, 1  ;;  %v921_v15 = vor.u32 %v920_v41, %v916_v56  ;;  %v688_v55 = vshrl.u32 %v2701_v19, 16  ;;  %v761_v25 = vsel %vm506_vm0, %v759_v59, %v760_v57  ;;  %v2140_v8 = vld [vmem:[%s2278_s7 + $0x5c] ss:$0 sps:$4 sm:$0x11]  }
  0x57   : > { %472 = vrot.lane.b32.xlu1 %v417_v14, %s2202_s20  ;;  %v676_v14 = vshrl.u32 %v2670_v6, 16  ;;  %v692_v3 = vrot.slane %v690_v49, 1  ;;  %v521_v28 = vsel %vm506_vm0, %v519_v22, %v520_v10  ;;  %v1818_v41 = vcombine.low %v230_v33, %v2653_v23 }
  0x58   : > { %777 = vrot.lane.b32.xlu0 %v758_v24, %s2202_s20  ;;  %v1776_v24 = vld [vmem:[%s2278_s7 + $0x58] sm:$0xf]  ;;  %v926_v2 = vsel %vm369_vm1, %v921_v15, %v925_v62  ;;  %v3025_v56 = vshrl.u32 %v2608_v18, 16  ;;  %v659_v10 = vshll.u32 %v2504_v12, 16  ;;  %v1004_v22 = vrot.slane %v2350_v1, 1 }
  0x59   : > { %v1866_v0 = vcombine.low %v1794_v7, %v1776_v24  ;;  %v681_v59 = vor.u32 %v680_v4, %v676_v14  ;;  %v1850_v37 = vcombine.low %v1775_v52, %v1776_v24  ;;  %v1013_v62 = vrot.slane %v2605_v61, 1 }
  0x5a   : > { %v669_v44 = vor.u32 %v2638_v36, %v3025_v56  ;;  %v1016_v23 = vrot.slane %v2660_v16, 1  ;;  %v2738_v4 = vsel %vm506_vm0, %v2320_v31, %v1004_v22  ;;  %v683_v12 = vshll.u32 %v2641_v48, 16 }
  0x5b   : > { %537 = vrot.lane.b32.xlu1 %v518_v58, %s2201_s19  ;;  %v431_v58 = vshrl.u32 %v2664_v27, 16  ;;  %v1018_v40 = vrot.slane %v1866_v0, 1  ;;  %v3024_v0 = vshrl.u32 %v2532_v51, 16  ;;  %v671_v51 = vshll.u32 %v2586_v5, 16 }
  0x5c   : > { %833 = vrot.lane.b32.xlu0 %v2593_v53, %s2201_s19  ;;  %v763_v53 = vrot.slane %v2691_v39, 1  ;;  %v2752_v61 = vsel %vm506_vm0, %v1015_v30, %v1016_v23  ;;  %v930_v31 = vshll.u32 %v1850_v37, 16  ;;  %v693_v16 = vor.u32 %v692_v3, %v688_v55 }
  0x5d   : > { %v657_v7 = vor.u32 %v2576_v21, %v3024_v0  ;;  %v436_v57 = vor.u32 %v435_v11, %v431_v58  ;;  %v1010_v21 = vrot.slane %v2541_v35, 1  ;;  %v1019_v11 = vrot.slane %v2140_v8, 1 }
  0x5e   : > { %v673_v1 = vrot.slane %v671_v51, 1  ;;  %v2749_v35 = vsel %vm506_vm0, %v2627_v29, %v1013_v62  ;;  %v1025_v29 = vrot.slane %v2467_v45, 1  ;;  %v695_v30 = vshll.u32 %v2691_v39, 16 }
  0x5f   : > { %593 = vrot.lane.b32.xlu1 %v2608_v18, %s2203_s21  ;;  %v661_v18 = vrot.slane %v659_v10, 1  ;;  %v2745_v5 = vsel %vm506_vm0, %v2562_v9, %v1010_v21  ;;  %v2758_v48 = vsel %vm506_vm0, %v1018_v40, %v1019_v11  ;;  %v441_v14 = vsel %vm369_vm1, %v436_v57, %v440_v38 }
  0x60   : > { %969 = vrot.lane.b32.xlu0 %v914_v42, %s2203_s21  ;;  %v2763_v9 = vsel %vm369_vm1, %v669_v44, %v673_v1  ;;  %v522_v24 = vrot.slane %v1818_v41, 1  ;;  %v523_v32 = vrot.slane %v2667_v26, 1  ;;  %v697_v42 = vrot.slane %v695_v30, 1 }
  0x61   : > { %v2755_v36 = vsel %vm369_vm1, %v657_v7, %v661_v18  ;;  %v764_v45 = vsel %vm506_vm0, %v762_v43, %v763_v53  ;;  %v928_v40 = vshrl.u32 %v1850_v37, 16  ;;  %v932_v49 = vrot.slane %v930_v31, 1 }
  0x62   : > { %v935_v39 = vshll.u32 %v2140_v8, 16  ;;  %v2780_v38 = vsel %vm369_vm1, %v693_v16, %v697_v42  ;;  %v524_v26 = vsel %vm506_vm0, %v522_v24, %v523_v32 }
  0x63   : > { %474 = vrot.lane.b32.xlu1 %v429_v46, %s2202_s20  ;;  %v933_v46 = vor.u32 %v932_v49, %v928_v40 }
  0x64   : > { %779 = vrot.lane.b32.xlu0 %v761_v25, %s2202_s20  ;;  %v937_v33 = vrot.slane %v935_v39, 1 }
  0x67   : > { %539 = vrot.lane.b32.xlu1 %v521_v28, %s2201_s19 }
  0x68   : > { %835 = vrot.lane.b32.xlu0 %v2649_v13, %s2201_s19  ;;  %v685_v13 = vrot.slane %v683_v12, 1  ;;  %v3026_v12 = vld [vmem:[#allocation7_spill] sm:$0xff] }
  0x6a   : > { %v2770_v58 = vsel %vm369_vm1, %v681_v59, %v685_v13 }
  0x6b   : > { %595 = vrot.lane.b32.xlu1 %v2670_v6, %s2203_s21  ;;  %v2775_v6 = vsel %vm506_vm0, %v2493_v63, %v1025_v29  ;;  %v938_v63 = vsel %vm369_vm1, %v933_v46, %v937_v33 }
  0x6c   : > { %971 = vrot.lane.b32.xlu0 %v926_v2, %s2203_s21 }
  0x6f   : > { %476 = vrot.lane.b32.xlu1 %v441_v14, %s2202_s20 }
  0x70   : > { %781 = vrot.lane.b32.xlu0 %v764_v45, %s2202_s20 }
  0x73   : > { %541 = vrot.lane.b32.xlu1 %v524_v26, %s2201_s19 }
  0x74   : > { %837 = vrot.lane.b32.xlu0 %v1850_v37, %s2201_s19 }
  0x77   : > { %597 = vrot.lane.b32.xlu1 %v2701_v19, %s2203_s21 }
  0x78   : > { %973 = vrot.lane.b32.xlu0 %v938_v63, %s2203_s21 }
  0x8c   : > { %v840_v43 = vpop.permute.xlu0 %839 }
  0x8d   : > { %v828_v53 = vpop.permute.xlu1 %827 }
  0x91   : > { %v772_v15 = vpop.permute.xlu0 %771  ;;  %v588_v52 = vpop.permute.xlu1 %587 }
  0x92   : > { %v1088_v8 = vsel %vm1027_vm2, %v2523_v34, %v772_v15 }
  0x93   : > { %v1111_v56 = vsel %vm1044_vm3, %v1088_v8, %v828_v53 }
  0x95   : > { %v784_v55 = vpop.permute.xlu0 %783  ;;  %v532_v3 = vpop.permute.xlu1 %531 }
  0x96   : > { %v1106_v44 = vsel %vm1027_vm2, %v2600_v60, %v784_v55  ;;  %v2158_v60 = vld [vmem:[%s3010_s1 + $0x88] sm:$0xff]  }
  0x97   : > { %v1123_v10 = vsel %vm1044_vm3, %v1106_v44, %v840_v43 }
  0x99   : > { %v544_v25 = vpop.permute.xlu1 %543 }
  0x9a   : > { %v467_v28 = vpop.permute.xlu0 %466 }
  0x9b   : > { %v1029_v0 = vsel %vm1027_vm2, %v2334_v47, %v467_v28  ;;  %v3029_v28 = vld [vmem:[#allocation5_spill] sm:$0xff] }
  0x9c   : > { %v1046_v19 = vsel %vm1044_vm3, %v1029_v0, %v532_v3 }
  0x9d   : > { %v479_v7 = vpop.permute.xlu1 %478  ;;  %v1063_v34 = vsel %vm1061_vm4, %v1046_v19, %v588_v52  ;;  %v1795_v19 = vld [vmem:[%s2278_s7 + $0x60] sm:$0xe] }
  0x9e   : > { %v1041_v2 = vsel %vm1027_vm2, %v2338_v50, %v479_v7  ;;  %v964_v41 = vpop.permute.xlu0 %963 }
  0x9f   : > { %v1127_v59 = vsel %vm1061_vm4, %v1111_v56, %v964_v41  ;;  %v1058_v57 = vsel %vm1044_vm3, %v1041_v2, %v544_v25  ;;  %v2159_v41 = vld [vmem:[%s2278_s7 + $0x64] sm:$0xf] }
  0xa0   : > { %1357 = vmatprep.mubr.bf16.mxu0 %v1127_v59  ;;  %v1867_v56 = vcombine.low %v1795_v19, %v2159_v41 }
  0xa1   : > { %v600_v47 = vpop.permute.xlu1 %599  ;;  %1358 = vmatmul.mubr.bf16.vlgmr.msra.gmra.mrb[0].mxu0 %v1063_v34 }
  0xa2   : > { %v976_v37 = vpop.permute.xlu0 %975  ;;  %v1081_v50 = vsel %vm1061_vm4, %v1058_v57, %v600_v47  ;;  %v1021_v34 = vrot.slane %v1867_v56, 1  ;;  %v2160_v47 = vld [vmem:[%s2278_s7 + $0x68] ss:$0 sps:$4 sm:$0x11]   ;;  %v3030_v57 = vld [vmem:[#allocation4_spill] sm:$0xff]  ;;  %s1722_s7 = sshll.u32 %s2183_s12, 3 }
  0xa3   : > { %v1145_v22 = vsel %vm1061_vm4, %v1123_v10, %v976_v37  ;;  %p188_p6 = scmp.lt.s32.totalorder %s1722_s7, 15 }
  0xa4   : > { %1405 = vmatprep.mubr.bf16.mxu1 %v1145_v22 }
  0xa5   : > { %v469_v51 = vpop.permute.xlu1 %468  ;;  %1406 = vmatmul.mubr.bf16.vlgmr.msra.gmra.mrb[0].mxu1 %v1081_v50  ;;  %s3045_s7 = smov (!%p188_p6, %s1722_s7), 15 }
  0xa6   : > { %v774_v21 = vpop.permute.xlu0 %773  ;;  %1990 = vmatpush3.bf16.msra.mxu1 %v2538_v54  ;;  %v1031_v18 = vsel %vm1027_vm2, %v2366_v20, %v469_v51  ;;  %v3027_v20 = vld [vmem:[#allocation2_spill] sm:$0xff]  ;;  %s1723_s26 = sshll.u32 %s3045_s7, 2 }
  0xa7   : > { %1991 = vmatprep.subr.bf16.mxu1 %v2158_v60  ;;  %v1091_v1 = vsel %vm1027_vm2, %v3026_v12, %v774_v21  ;;  %s192_s28 = sadd.s32 %s1724_s27, %s1723_s26 }
  0xa8   : > { %s1725_s29 = sshll.u32 %s192_s28, 3 }
  0xa9   : > { %v534_v62 = vpop.permute.xlu1 %533  ;;  %s2894_s13 = scalar_lea.vmem %s3012_s3, %s1725_s29 }
  0xaa   : > { %v830_v23 = vpop.permute.xlu0 %829  ;;  %1992 = vmatpush3.bf16.msra.mxu1 %v2158_v60  ;;  %v1048_v31 = vsel %vm1044_vm3, %v1031_v18, %v534_v62 }
  0xab   : > { %v1113_v13 = vsel %vm1044_vm3, %v1091_v1, %v830_v23 }
  0xad   : > { %v590_v11 = vpop.permute.xlu1 %589 }
  0xae   : > { %v966_v29 = vpop.permute.xlu0 %965  ;;  %v1066_v16 = vsel %vm1061_vm4, %v1048_v31, %v590_v11  ;;  %v3031_v11 = vld [vmem:[#allocation6_spill] sm:$0xff] }
  0xaf   : > { %v1130_v54 = vsel %vm1061_vm4, %v1113_v13, %v966_v29 }
  0xb0   : > { %1365 = vmatprep.mubr.bf16.mxu0 %v1130_v54 }
  0xb1   : > { %v481_v30 = vpop.permute.xlu1 %480  ;;  %1366 = vmatmul.mubr.bf16.gmra.mrb[4].mxu0 %v1066_v16 }
  0xb2   : > { %v786_v14 = vpop.permute.xlu0 %785  ;;  %v1043_v42 = vsel %vm1027_vm2, %v3027_v20, %v481_v30 }
  0xb3   : > { %v1109_v40 = vsel %vm1027_vm2, %v2705_v17, %v786_v14  ;;  %v3028_v17 = vld [vmem:[#allocation3_spill] sm:$0xff] }
  0xb5   : > { %v546_v24 = vpop.permute.xlu1 %545 }
  0xb6   : > { %v842_v32 = vpop.permute.xlu0 %841  ;;  %v1060_v49 = vsel %vm1044_vm3, %v1043_v42, %v546_v24 }
  0xb7   : > { %v1125_v39 = vsel %vm1044_vm3, %v1109_v40, %v842_v32 }
  0xb9   : > { %v602_v45 = vpop.permute.xlu1 %601 }
  0xba   : > { %v978_v26 = vpop.permute.xlu0 %977  ;;  %v1084_v46 = vsel %vm1061_vm4, %v1060_v49, %v602_v45 }
  0xbb   : > { %v1148_v33 = vsel %vm1061_vm4, %v1125_v39, %v978_v26 }
  0xbc   : > { %1413 = vmatprep.mubr.bf16.mxu1 %v1148_v33 }
  0xbd   : > { %v471_v63 = vpop.permute.xlu1 %470  ;;  %1414 = vmatmul.mubr.bf16.gmra.mrb[4].mxu1 %v1084_v46 }
  0xbe   : > { %v776_v43 = vpop.permute.xlu0 %775  ;;  %1993 = vmatprep.mubr.msk.bf16.mxu1 %vm1027_vm2, %v2738_v4  ;;  %v1033_v52 = vsel %vm1027_vm2, %v3028_v17, %v471_v63 }
  0xbf   : > { %v1094_v3 = vsel %vm1027_vm2, %v2755_v36, %v776_v43 }
  0xc1   : > { %v536_v53 = vpop.permute.xlu1 %535 }
  0xc2   : > { %v832_v15 = vpop.permute.xlu0 %831  ;;  %v1050_v25 = vsel %vm1044_vm3, %v1033_v52, %v536_v53 }
  0xc3   : > { %v1115_v8 = vsel %vm1044_vm3, %v1094_v3, %v832_v15 }
  0xc5   : > { %v592_v55 = vpop.permute.xlu1 %591  ;;  %1994 = vmatmul.mubr.msk.bf16.vlgmr.msra.gmra.mrb[8].mxu1 %vm1027_vm2, %v3029_v28 }
  0xc6   : > { %v968_v0 = vpop.permute.xlu0 %967  ;;  %v1069_v4 = vsel %vm1061_vm4, %v1050_v25, %v592_v55  ;;  %1997 = vmatprep.mubr.msk.bf16.mxu1 %vm1027_vm2, %v2745_v5  ;;  %v1022_v5 = vrot.slane %v2160_v47, 1 }
  0xc7   : > { %v1133_v7 = vsel %vm1061_vm4, %v1115_v8, %v968_v0 }
  0xc8   : > { %1373 = vmatprep.mubr.bf16.mxu0 %v1133_v7 }
  0xc9   : > { %v473_v2 = vpop.permute.xlu1 %472  ;;  %1374 = vmatmul.mubr.bf16.gmra.mrb[8].mxu0 %v1069_v4 }
  0xca   : > { %v778_v36 = vpop.permute.xlu0 %777  ;;  %v1035_v37 = vsel %vm1027_vm2, %v3030_v57, %v473_v2 }
  0xcb   : > { %v1097_v50 = vsel %vm1027_vm2, %v2763_v9, %v778_v36 }
  0xcd   : > { %v538_v44 = vpop.permute.xlu1 %537  ;;  %1998 = vmatmul.mubr.msk.bf16.gmra.mrb[12].mxu1 %vm1027_vm2, %v2749_v35 }
  0xce   : > { %v834_v59 = vpop.permute.xlu0 %833  ;;  %2001 = vmatprep.mubr.msk.bf16.mxu1 %vm1027_vm2, %v2752_v61  ;;  %v1052_v22 = vsel %vm1044_vm3, %v1035_v37, %v538_v44  ;;  %v1023_v61 = vsel %vm506_vm0, %v1021_v34, %v1022_v5  ;;  %v2888_v44 = vld [vmem:[%s3011_s2] ss:$0 sm:$0xff] }
  0xcf   : > { %v1117_v60 = vsel %vm1044_vm3, %v1097_v50, %v834_v59 }
  0xd1   : > { %v594_v10 = vpop.permute.xlu1 %593 }
  0xd2   : > { %v970_v51 = vpop.permute.xlu0 %969  ;;  %v1072_v35 = vsel %vm1061_vm4, %v1052_v22, %v594_v10 }
  0xd3   : > { %v1136_v21 = vsel %vm1061_vm4, %v1117_v60, %v970_v51 }
  0xd4   : > { %1381 = vmatprep.mubr.bf16.mxu0 %v1136_v21 }
  0xd5   : > { %v475_v62 = vpop.permute.xlu1 %474  ;;  %1382 = vmatmul.mubr.bf16.gmra.mrb[12].mxu0 %v1072_v35  ;;  %2002 = vmatmul.mubr.msk.bf16.gmra.mrb[16].mxu1 %vm1027_vm2, %v2758_v48 }
  0xd6   : > { %v780_v23 = vpop.permute.xlu0 %779  ;;  %2005 = vmatprep.mubr.msk.bf16.mxu1 %vm1027_vm2, %v1023_v61  ;;  %v1037_v12 = vsel %vm1027_vm2, %v3031_v11, %v475_v62 }
  0xd7   : > { %v1100_v31 = vsel %vm1027_vm2, %v2770_v58, %v780_v23 }
  0xd9   : > { %v540_v9 = vpop.permute.xlu1 %539 }
  0xda   : > { %v836_v18 = vpop.permute.xlu0 %835  ;;  %v1054_v13 = vsel %vm1044_vm3, %v1037_v12, %v540_v9 }
  0xdb   : > { %v1119_v29 = vsel %vm1044_vm3, %v1100_v31, %v836_v18 }
  0xdd   : > { %v596_v1 = vpop.permute.xlu1 %595  ;;  %2006 = vmatmul.mubr.msk.bf16.gmra.mrb[20].mxu1 %vm1027_vm2, %v2775_v6 }
  0xde   : > { %v972_v48 = vpop.permute.xlu0 %971  ;;  %v1075_v16 = vsel %vm1061_vm4, %v1054_v13, %v596_v1 }
  0xdf   : > { %v1139_v54 = vsel %vm1061_vm4, %v1119_v29, %v972_v48 }
  0xe0   : > { %1389 = vmatprep.mubr.bf16.mxu0 %v1139_v54 }
  0xe1   : > { %v477_v30 = vpop.permute.xlu1 %476  ;;  %1390 = vmatmul.mubr.bf16.gmra.mrb[16].mxu0 %v1075_v16 }
  0xe2   : > { %v782_v14 = vpop.permute.xlu0 %781  ;;  %v1039_v58 = vsel %vm1027_vm2, %v2664_v27, %v477_v30 }
  0xe3   : > { %v1103_v6 = vsel %vm1027_vm2, %v2780_v38, %v782_v14 }
  0xe5   : > { %v542_v24 = vpop.permute.xlu1 %541 }
  0xe6   : > { %v838_v32 = vpop.permute.xlu0 %837  ;;  %v1056_v42 = vsel %vm1044_vm3, %v1039_v58, %v542_v24 }
  0xe7   : > { %v1121_v45 = vsel %vm1044_vm3, %v1103_v6, %v838_v32 }
  0xe9   : > { %v598_v20 = vpop.permute.xlu1 %597 }
  0xea   : > { %v974_v40 = vpop.permute.xlu0 %973  ;;  %v1078_v49 = vsel %vm1061_vm4, %v1056_v42, %v598_v20 }
  0xeb   : > { %v1142_v39 = vsel %vm1061_vm4, %v1121_v45, %v974_v40 }
  0xec   : > { %1397 = vmatprep.mubr.bf16.mxu0 %v1142_v39 }
  0xed   : > { %1398 = vmatmul.mubr.bf16.gmra.mrb[20].mxu0 %v1078_v49 }
 0x174   : > { %v1931_v26 = vpop.f32.mrb[0].mxu0 }
 0x175   : > { %v1932_v46 = vpop.f32.mrb[1].mxu0 }
 0x176   : > { %v1933_v33 = vadd.f32 %v1932_v46, %v1931_v26  ;;  %v1934_v27 = vpop.f32.mrb[2].mxu0 }
 0x177   : > { %v1935_v63 = vpop.f32.mrb[3].mxu0 }
 0x178   : > { %v1936_v43 = vadd.f32 %v1935_v63, %v1934_v27  ;;  %v1967_v53 = vpop.f32.mrb[0].mxu1  ;;  %v1360_v47 = vadd.f32 %v1933_v33, %v2888_v44 }
 0x179   : > { %v1968_v38 = vpop.f32.mrb[1].mxu1 }
 0x17a   : > { %v2877_v15 = vadd.f32 %v1968_v38, %v1967_v53  ;;  %v1970_v17 = vpop.f32.mrb[2].mxu1  ;;  %v1363_v22 = vadd.f32 %v1936_v43, %v2888_v44 }
 0x17b   : > { %v1971_v52 = vpop.f32.mrb[3].mxu1 }
 0x17c   : > { %v2879_v55 = vadd.f32 %v1971_v52, %v1970_v17  ;;  %v1408_v33 = vadd.f32 %v2877_v15, %v2888_v44 }
 0x17e   : > { %v1411_v52 = vadd.f32 %v2879_v55, %v2888_v44 }
 0x184   : > { %v1937_v3 = vpop.f32.mrb[4].mxu0 }
 0x185   : > { %v1938_v25 = vpop.f32.mrb[5].mxu0 }
 0x186   : > { %v1939_v28 = vadd.f32 %v1938_v25, %v1937_v3  ;;  %v1940_v8 = vpop.f32.mrb[6].mxu0 }
 0x187   : > { %v1941_v0 = vpop.f32.mrb[7].mxu0 }
 0x188   : > { %v1942_v4 = vadd.f32 %v1941_v0, %v1940_v8  ;;  %v1368_v59 = vadd.f32 %v1939_v28, %v2888_v44 }
 0x18a   : > { %v1371_v37 = vadd.f32 %v1942_v4, %v2888_v44 }
 0x190   : > { %v1973_v7 = vpop.f32.mrb[4].mxu1 }
 0x191   : > { %v1974_v19 = vpop.f32.mrb[5].mxu1 }
 0x192   : > { %v1975_v2 = vadd.f32 %v1974_v19, %v1973_v7  ;;  %v1976_v36 = vpop.f32.mrb[6].mxu1 }
 0x193   : > { %v1977_v41 = vpop.f32.mrb[7].mxu1 }
 0x194   : > { %v2883_v56 = vadd.f32 %v1977_v41, %v1976_v36  ;;  %v1416_v26 = vadd.f32 %v1975_v2, %v2888_v44 }
 0x196   : > { %v1419_v53 = vadd.f32 %v2883_v56, %v2888_v44 }
 0x198   : > { %v1995_v34 = vpop.f32.mrb[8].mxu1 }
 0x199   : > { %v1465_v5 = vadd.f32 %v1995_v34, %v1368_v59  ;;  %v1456_v57 = vpop.f32.mrb[9].mxu1 }
 0x19a   : > { %v1457_v10 = vadd.f32 %v1456_v57, %v1360_v47  ;;  %v1996_v50 = vpop.f32.mrb[10].mxu1 }
 0x19b   : > { %1521 = vst.msk [vmem:[%s2894_s13 + $0x20] sm:$0xff] %vm1044_vm3, %v1465_v5  ;;  %v1468_v60 = vadd.f32 %v1996_v50, %v1371_v37  ;;  %1555 = vrot.lane.b32.xlu0 %v1465_v5, %s2201_s19  ;;  %v1459_v51 = vpop.f32.mrb[11].mxu1 }
 0x19c   : > { %1519 = vst.msk [vmem:[%s2894_s13] sm:$0xff] %vm1044_vm3, %v1457_v10  ;;  %v1460_v35 = vadd.f32 %v1459_v51, %v1363_v22  ;;  %v1943_v21 = vpop.f32.mrb[8].mxu0 }
 0x19d   : > { %1522 = vst.msk [vmem:[%s2894_s13 + $0x28] sm:$0xff] %vm1044_vm3, %v1468_v60  ;;  %1557 = vrot.lane.b32.xlu1 %v1468_v60, %s2201_s19  ;;  %v1944_v61 = vpop.f32.mrb[9].mxu0 }
 0x19e   : > { %1520 = vst.msk [vmem:[%s2894_s13 + $0x8] sm:$0xff] %vm1044_vm3, %v1460_v35  ;;  %v1945_v62 = vadd.f32 %v1944_v61, %v1943_v21  ;;  %v1946_v23 = vpop.f32.mrb[10].mxu0 }
 0x19f   : > { %1551 = vrot.lane.b32.xlu0 %v1457_v10, %s2201_s19  ;;  %v1947_v9 = vpop.f32.mrb[11].mxu0 }
 0x1a0   : > { %v1948_v18 = vadd.f32 %v1947_v9, %v1946_v23  ;;  %v1999_v11 = vpop.f32.mrb[12].mxu1  ;;  %v1376_v12 = vadd.f32 %v1945_v62, %v2888_v44 }
 0x1a1   : > { %v1472_v1 = vpop.f32.mrb[13].mxu1  ;;  %1553 = vrot.lane.b32.xlu1 %v1460_v35, %s2201_s19 }
 0x1a2   : > { %v1473_v31 = vadd.f32 %v1472_v1, %v1376_v12  ;;  %v2000_v13 = vpop.f32.mrb[14].mxu1  ;;  %v1379_v29 = vadd.f32 %v1948_v18, %v2888_v44 }
 0x1a3   : > { %v1475_v48 = vpop.f32.mrb[15].mxu1 }
 0x1a4   : > { %1523 = vst.msk [vmem:[%s2894_s13 + $0x40] sm:$0xff] %vm1044_vm3, %v1473_v31  ;;  %v1476_v16 = vadd.f32 %v1475_v48, %v1379_v29  ;;  %1559 = vrot.lane.b32.xlu0 %v1473_v31, %s2201_s19 }
 0x1a6   : > { %1524 = vst.msk [vmem:[%s2894_s13 + $0x48] sm:$0xff] %vm1044_vm3, %v1476_v16  ;;  %1561 = vrot.lane.b32.xlu1 %v1476_v16, %s2201_s19 }
 0x1a8   : > { %v1949_v54 = vpop.f32.mrb[12].mxu0  ;;  %v2003_v30 = vpop.f32.mrb[16].mxu1 }
 0x1a9   : > { %v1950_v14 = vpop.f32.mrb[13].mxu0  ;;  %v1488_v24 = vpop.f32.mrb[17].mxu1 }
 0x1aa   : > { %v1951_v32 = vadd.f32 %v1950_v14, %v1949_v54  ;;  %v1952_v58 = vpop.f32.mrb[14].mxu0  ;;  %v2004_v20 = vpop.f32.mrb[18].mxu1 }
 0x1ab   : > { %v1953_v6 = vpop.f32.mrb[15].mxu0  ;;  %v1491_v42 = vpop.f32.mrb[19].mxu1 }
 0x1ac   : > { %v1384_v45 = vadd.f32 %v1951_v32, %v2888_v44  ;;  %v1954_v40 = vadd.f32 %v1953_v6, %v1952_v58 }
 0x1ae   : > { %v1387_v49 = vadd.f32 %v1954_v40, %v2888_v44  ;;  %v1481_v39 = vadd.f32 %v1999_v11, %v1384_v45 }
 0x1b0   : > { %v2007_v46 = vpop.f32.mrb[20].mxu1  ;;  %1563 = vrot.lane.b32.xlu0 %v1481_v39, %s2201_s19  ;;  %1525 = vst.msk [vmem:[%s2894_s13 + $0x60] sm:$0xff] %vm1044_vm3, %v1481_v39  ;;  %v1484_v27 = vadd.f32 %v2000_v13, %v1387_v49 }
 0x1b1   : > { %v1513_v63 = vadd.f32 %v2007_v46, %v1416_v26  ;;  %v1504_v43 = vpop.f32.mrb[21].mxu1 }
 0x1b2   : > { %v1505_v38 = vadd.f32 %v1504_v43, %v1408_v33  ;;  %v2008_v17 = vpop.f32.mrb[22].mxu1  ;;  %1565 = vrot.lane.b32.xlu1 %v1484_v27, %s2201_s19  ;;  %1526 = vst.msk [vmem:[%s2894_s13 + $0x68] sm:$0xff] %vm1044_vm3, %v1484_v27 }
 0x1b3   : > { %1533 = vst.msk [vmem:[%s2894_s13 + $0xe0] sm:$0xff] %vm1044_vm3, %v1513_v63  ;;  %v1516_v15 = vadd.f32 %v2008_v17, %v1419_v53  ;;  %v1507_v3 = vpop.f32.mrb[23].mxu1 }
 0x1b4   : > { %1531 = vst.msk [vmem:[%s2894_s13 + $0xc0] sm:$0xff] %vm1044_vm3, %v1505_v38  ;;  %v1508_v25 = vadd.f32 %v1507_v3, %v1411_v52  ;;  %v1955_v28 = vpop.f32.mrb[16].mxu0 }
 0x1b5   : > { %1534 = vst.msk [vmem:[%s2894_s13 + $0xe8] sm:$0xff] %vm1044_vm3, %v1516_v15  ;;  %v1956_v8 = vpop.f32.mrb[17].mxu0 }
 0x1b6   : > { %1532 = vst.msk [vmem:[%s2894_s13 + $0xc8] sm:$0xff] %vm1044_vm3, %v1508_v25  ;;  %v1957_v0 = vadd.f32 %v1956_v8, %v1955_v28  ;;  %v1958_v4 = vpop.f32.mrb[18].mxu0 }
 0x1b7   : > { %v1959_v7 = vpop.f32.mrb[19].mxu0 }
 0x1b8   : > { %v1392_v55 = vadd.f32 %v1957_v0, %v2888_v44  ;;  %v1960_v19 = vadd.f32 %v1959_v7, %v1958_v4 }
 0x1ba   : > { %v1395_v2 = vadd.f32 %v1960_v19, %v2888_v44  ;;  %v1489_v36 = vadd.f32 %v1488_v24, %v1392_v55 }
 0x1bc   : > { %1567 = vrot.lane.b32.xlu0 %v1489_v36, %s2201_s19  ;;  %1527 = vst.msk [vmem:[%s2894_s13 + $0x80] sm:$0xff] %vm1044_vm3, %v1489_v36  ;;  %v1492_v41 = vadd.f32 %v1491_v42, %v1395_v2 }
 0x1be   : > { %1569 = vrot.lane.b32.xlu1 %v1492_v41, %s2201_s19  ;;  %1528 = vst.msk [vmem:[%s2894_s13 + $0x88] sm:$0xff] %vm1044_vm3, %v1492_v41 }
 0x1c0   : > { %1575 = vrot.lane.b32.xlu0 %v1505_v38, %s2201_s19  ;;  %v1961_v56 = vpop.f32.mrb[20].mxu0 }
 0x1c1   : > { %v1962_v59 = vpop.f32.mrb[21].mxu0 }
 0x1c2   : > { %v1963_v34 = vadd.f32 %v1962_v59, %v1961_v56  ;;  %1577 = vrot.lane.b32.xlu1 %v1508_v25, %s2201_s19  ;;  %v1964_v47 = vpop.f32.mrb[22].mxu0 }
 0x1c3   : > { %v1965_v5 = vpop.f32.mrb[23].mxu0 }
 0x1c4   : > { %v1400_v57 = vadd.f32 %v1963_v34, %v2888_v44  ;;  %v1966_v37 = vadd.f32 %v1965_v5, %v1964_v47 }
 0x1c6   : > { %v1403_v10 = vadd.f32 %v1966_v37, %v2888_v44  ;;  %v1497_v50 = vadd.f32 %v2003_v30, %v1400_v57 }
 0x1c8   : > { %1571 = vrot.lane.b32.xlu0 %v1497_v50, %s2201_s19  ;;  %1529 = vst.msk [vmem:[%s2894_s13 + $0xa0] sm:$0xff] %vm1044_vm3, %v1497_v50  ;;  %v1500_v22 = vadd.f32 %v2004_v20, %v1403_v10 }
 0x1ca   : > { %1573 = vrot.lane.b32.xlu1 %v1500_v22, %s2201_s19  ;;  %1530 = vst.msk [vmem:[%s2894_s13 + $0xa8] sm:$0xff] %vm1044_vm3, %v1500_v22 }
 0x1cc   : > { %1579 = vrot.lane.b32.xlu0 %v1513_v63, %s2201_s19 }
 0x1ce   : > { %1581 = vrot.lane.b32.xlu1 %v1516_v15, %s2201_s19 }
 0x20d   : > { %v1556_v44 = vpop.permute.xlu0 %1555 }
 0x20e   : > { %1898 = vst.msk [vmem:[%s2894_s13 + $0x30] sm:$0xff] %vm1044_vm3, %v1556_v44 }
 0x20f   : > { %v1558_v60 = vpop.permute.xlu1 %1557 }
 0x210   : > { %1899 = vst.msk [vmem:[%s2894_s13 + $0x38] sm:$0xff] %vm1044_vm3, %v1558_v60 }
 0x211   : > { %v1552_v51 = vpop.permute.xlu0 %1551 }
 0x212   : > { %1896 = vst.msk [vmem:[%s2894_s13 + $0x10] sm:$0xff] %vm1044_vm3, %v1552_v51 }
 0x213   : > { %v1554_v35 = vpop.permute.xlu1 %1553 }
 0x214   : > { %1897 = vst.msk [vmem:[%s2894_s13 + $0x18] sm:$0xff] %vm1044_vm3, %v1554_v35 }
 0x216   : > { %v1560_v21 = vpop.permute.xlu0 %1559 }
 0x217   : > { %1900 = vst.msk [vmem:[%s2894_s13 + $0x50] sm:$0xff] %vm1044_vm3, %v1560_v21 }
 0x218   : > { %v1562_v61 = vpop.permute.xlu1 %1561 }
 0x219   : > { %1901 = vst.msk [vmem:[%s2894_s13 + $0x58] sm:$0xff] %vm1044_vm3, %v1562_v61 }
 0x222   : > { %v1564_v62 = vpop.permute.xlu0 %1563 }
 0x223   : > { %1902 = vst.msk [vmem:[%s2894_s13 + $0x70] sm:$0xff] %vm1044_vm3, %v1564_v62 }
 0x224   : > { %v1566_v23 = vpop.permute.xlu1 %1565 }
 0x225   : > { %1903 = vst.msk [vmem:[%s2894_s13 + $0x78] sm:$0xff] %vm1044_vm3, %v1566_v23 }
 0x22e   : > { %v1568_v9 = vpop.permute.xlu0 %1567 }
 0x22f   : > { %1904 = vst.msk [vmem:[%s2894_s13 + $0x90] sm:$0xff] %vm1044_vm3, %v1568_v9 }
 0x230   : > { %v1570_v18 = vpop.permute.xlu1 %1569 }
 0x231   : > { %1905 = vst.msk [vmem:[%s2894_s13 + $0x98] sm:$0xff] %vm1044_vm3, %v1570_v18 }
 0x232   : > { %v1576_v11 = vpop.permute.xlu0 %1575 }
 0x233   : > { %1908 = vst.msk [vmem:[%s2894_s13 + $0xd0] sm:$0xff] %vm1044_vm3, %v1576_v11 }
 0x234   : > { %v1578_v12 = vpop.permute.xlu1 %1577 }
 0x235   : > { %1909 = vst.msk [vmem:[%s2894_s13 + $0xd8] sm:$0xff] %vm1044_vm3, %v1578_v12 }
 0x23a   : > { %v1572_v1 = vpop.permute.xlu0 %1571 }
 0x23b   : > { %1906 = vst.msk [vmem:[%s2894_s13 + $0xb0] sm:$0xff] %vm1044_vm3, %v1572_v1 }
 0x23c   : > { %v1574_v31 = vpop.permute.xlu1 %1573 }
 0x23d   : > { %1907 = vst.msk [vmem:[%s2894_s13 + $0xb8] sm:$0xff] %vm1044_vm3, %v1574_v31 }
 0x23e   : > { %v1580_v13 = vpop.permute.xlu0 %1579 }
 0x23f   : > { %1910 = vst.msk [vmem:[%s2894_s13 + $0xf0] sm:$0xff] %vm1044_vm3, %v1580_v13 }
 0x240   : > { %v1582_v29 = vpop.permute.xlu1 %1581 }
 0x241   : > { %1911 = vst.msk [vmem:[%s2894_s13 + $0xf8] sm:$0xff] %vm1044_vm3, %v1582_v29 }
 0x242 PF: > { %s13_s16 = sadd.s32 1, %s2199_s16   ;;  %s3032_s12 = smov %s2191_s14 }
 0x243   : > { %p10_p7 = scmp.ge.s32.totalorder %s13_s16, 6   ;;  %s3033_s13 = smov %s2195_s15 }
 0x244   : > { %s3034_s14 = smov %s3037_s17  ;;  %s3035_s15 = smov %s3041_s18 }
 0x245   :  { %12 = sbr.rel (!%p10_p7) target bundleno = 3 (0x3), region = 66 }

</bundles_post_ra>
